<compile_context>
chip_gen: v6e
topology: v6e:2x2x1
jax: 0.10.0
libtpu: 0.0.40
codegen_flags: <defaults>
</compile_context>

<pallas_src>
import jax
import jax.numpy as jnp
from jax.experimental import pallas as pl
from jax.experimental.pallas import tpu as pltpu

# ---- model sizes (small, consistent with the module) ----
B = 2        # batch
T = 8        # sequence length
CIN = 4      # in_channels
H = 16       # LSTM hidden size / RnnLayer out_channels
H1 = 64      # NnLayer hidden
OUT = 8      # output_size
F32 = jnp.float32


def device_model_kernel(
    x_ref,                          # (T*B, CIN)  time-major flattened input
    w_ih0_ref, w_hh0_ref, b0_ref,   # LSTM layer 0: (CIN,4H), (H,4H), (1,4H)
    w1_ref, b1_ref,                 # LSTM layer 1 stacked: (2H,4H), (1,4H)
    w_fcn1_ref, b_fcn1_ref,         # fc folded into NnLayer1: (H,H1), (1,H1)
    w_n2_ref, b_n2_ref,             # NnLayer 64->64
    w_n3_ref, b_n3_ref,             # NnLayer 64->OUT
    w_rg_ref, b_rg_ref,             # regression OUT->1
    h_out_ref,                      # (B, OUT)
    reg_out_ref,                    # (B, 1)
):
    # Hoist weight loads out of the (unrolled) time loop.
    w_hh0 = w_hh0_ref[...]
    w1 = w1_ref[...]

    # Hoisted layer-0 input projection (no recurrent dependence): one matmul
    # for all T steps, bias pre-added, removed from the serial chain.
    x_proj = (jnp.dot(x_ref[...].astype(F32), w_ih0_ref[...],
                      preferred_element_type=F32)
              + jnp.broadcast_to(b0_ref[...], (T * B, 4 * H)))

    # Pre-broadcast layer-1 bias once (JAX does not CSE broadcast_in_dim).
    b1_b = jnp.broadcast_to(b1_ref[...], (B, 4 * H))

    h0 = jnp.zeros((B, H), F32)
    c0 = jnp.zeros((B, H), F32)
    h1 = jnp.zeros((B, H), F32)
    c1 = jnp.zeros((B, H), F32)

    # 2-layer LSTM, fully unrolled over time (T=8 is static and tiny).
    # Gate order matches PyTorch: i, f, g, o.
    # TODO(synk): nn.LSTM dropout=0.1 between layers applies only in training
    # mode; eval-mode semantics (no dropout) are implemented here.
    for t in range(T):
        # ----- layer 0: only the recurrent matmul is on the critical path.
        g0 = (x_proj[t * B:(t + 1) * B, :]
              + jnp.dot(h0, w_hh0, preferred_element_type=F32))
        s0 = jax.nn.sigmoid(g0)            # whole-vreg EUP pass
        tg0 = jnp.tanh(g0)                 # whole-vreg EUP pass
        i0 = s0[:, 0 * H:1 * H]
        f0 = s0[:, 1 * H:2 * H]
        gg0 = tg0[:, 2 * H:3 * H]
        o0 = s0[:, 3 * H:4 * H]
        c0 = f0 * c0 + i0 * gg0
        h0 = o0 * jnp.tanh(c0)

        # ----- layer 1: fused input+recurrent matmul: [h0, h1] @ [Wih1; Whh1]
        g1 = (jnp.dot(jnp.concatenate([h0, h1], axis=1), w1,
                      preferred_element_type=F32)
              + b1_b)
        s1 = jax.nn.sigmoid(g1)
        tg1 = jnp.tanh(g1)
        i1 = s1[:, 0 * H:1 * H]
        f1 = s1[:, 1 * H:2 * H]
        gg1 = tg1[:, 2 * H:3 * H]
        o1 = s1[:, 3 * H:4 * H]
        c1 = f1 * c1 + i1 * gg1
        h1 = o1 * jnp.tanh(c1)

    # out[:, -1, :] of the LSTM == top-layer hidden at the last step.
    # RnnLayer.fc has no nonlinearity, so it is folded into NnLayer1 offline.
    y = jnp.maximum(
        jnp.dot(h1, w_fcn1_ref[...], preferred_element_type=F32)
        + b_fcn1_ref[...], 0.0)
    y = jnp.maximum(
        jnp.dot(y, w_n2_ref[...], preferred_element_type=F32)
        + b_n2_ref[...], 0.0)
    h = jnp.maximum(
        jnp.dot(y, w_n3_ref[...], preferred_element_type=F32)
        + b_n3_ref[...], 0.0)

    reg = jnp.dot(h, w_rg_ref[...], preferred_element_type=F32) + b_rg_ref[...]

    h_out_ref[...] = h.astype(h_out_ref.dtype)
    reg_out_ref[...] = reg.astype(reg_out_ref.dtype)


def device_model_forward(x, params):
    """x: (B, T, CIN) batch-first, like the PyTorch module."""
    # Time-major flatten so per-step slices of the hoisted projection are
    # contiguous sublane slices (the transpose itself is a ~256 B XLA op).
    x_tm = jnp.transpose(x, (1, 0, 2)).reshape(T * B, CIN).astype(F32)

    # ---- one-time offline folds (outside the kernel) ----
    # Stack layer-1 input/recurrent weights so the cell issues one matmul.
    w1 = jnp.concatenate([params["w_ih1"], params["w_hh1"]], axis=0)  # (2H,4H)
    # Fold fc (no activation) into NnLayer1: exact algebraic fold.
    w_fcn1 = jnp.dot(params["w_fc"], params["w_n1"])                  # (H,H1)
    b_fcn1 = jnp.dot(params["b_fc"], params["w_n1"]) + params["b_n1"]

    args = (
        x_tm,
        params["w_ih0"], params["w_hh0"], params["b0"],
        w1, params["b1"],
        w_fcn1, b_fcn1,
        params["w_n2"], params["b_n2"],
        params["w_n3"], params["b_n3"],
        params["w_rg"], params["b_rg"],
    )

    vmem = pl.BlockSpec(memory_space=pltpu.MemorySpace.VMEM)
    # Rough cost hint so XLA schedules surrounding ops sensibly.
    cost = pl.CostEstimate(flops=130_000, transcendentals=4_700,
                           bytes_accessed=40_000)

    out = pl.pallas_call(
        device_model_kernel,
        out_shape=(
            jax.ShapeDtypeStruct((B, OUT), F32),
            jax.ShapeDtypeStruct((B, 1), F32),
        ),
        in_specs=[vmem] * len(args),
        out_specs=(vmem, vmem),
        cost_estimate=cost,
    )(*args)
    # NOTE: at B=2 there is no benefit to a batch grid; if batch grows,
    # add grid=(B//tb,) with dimension_semantics=("parallel",) for v7x's 2 TCs.
    return out  # (h, regression(h))


def make_params(key):
    """Deterministic synthetic parameters (shapes follow the PyTorch module).
    All linear weights are stored transposed: (in_features, out_features)."""
    ks = list(jax.random.split(key, 16))

    def w(k, shape, scale=0.1):
        return (scale * jax.random.normal(k, shape)).astype(F32)

    return {
        # LSTM layer 0: weight_ih_l0 (4H, CIN) -> stored (CIN, 4H), etc.
        "w_ih0": w(ks[0], (CIN, 4 * H)),
        "w_hh0": w(ks[1], (H, 4 * H)),
        "b0":    w(ks[2], (1, 4 * H)),     # b_ih_l0 + b_hh_l0 combined
        # LSTM layer 1
        "w_ih1": w(ks[3], (H, 4 * H)),
        "w_hh1": w(ks[4], (H, 4 * H)),
        "b1":    w(ks[5], (1, 4 * H)),
        # RnnLayer.fc : Linear(16, 16)
        "w_fc":  w(ks[6], (H, H)),
        "b_fc":  w(ks[7], (1, H)),
        # NnLayer(16, 64)
        "w_n1":  w(ks[8], (H, H1)),
        "b_n1":  w(ks[9], (1, H1)),
        # NnLayer(64, 64)
        "w_n2":  w(ks[10], (H1, H1)),
        "b_n2":  w(ks[11], (1, H1)),
        # NnLayer(64, OUT)
        "w_n3":  w(ks[12], (H1, OUT)),
        "b_n3":  w(ks[13], (1, OUT)),
        # regression Linear(OUT, 1)
        "w_rg":  w(ks[14], (OUT, 1)),
        "b_rg":  w(ks[15], (1, 1)),
    }


if __name__ == "__main__":
    key = jax.random.PRNGKey(0)
    k_x, k_p = jax.random.split(key)
    x = jax.random.normal(k_x, (B, T, CIN), dtype=F32)   # (batch, seq, in_channels)
    params = make_params(k_p)

    fwd = jax.jit(device_model_forward)
    h, reg = fwd(x, params)
    jax.block_until_ready((h, reg))

    assert h.shape == (B, OUT) and reg.shape == (B, 1)
    print("KERNEL_OK")
</pallas_src>

<mosaic_0001>
module attributes {stable_mosaic.version = 11 : i64} {
  func.func @device_model_kernel(%arg0: memref<16x4xf32, #tpu.memory_space<vmem>>, %arg1: memref<4x64xf32, #tpu.memory_space<vmem>>, %arg2: memref<16x64xf32, #tpu.memory_space<vmem>>, %arg3: memref<1x64xf32, #tpu.memory_space<vmem>>, %arg4: memref<32x64xf32, #tpu.memory_space<vmem>>, %arg5: memref<1x64xf32, #tpu.memory_space<vmem>>, %arg6: memref<16x64xf32, #tpu.memory_space<vmem>>, %arg7: memref<1x64xf32, #tpu.memory_space<vmem>>, %arg8: memref<64x64xf32, #tpu.memory_space<vmem>>, %arg9: memref<1x64xf32, #tpu.memory_space<vmem>>, %arg10: memref<64x8xf32, #tpu.memory_space<vmem>>, %arg11: memref<1x8xf32, #tpu.memory_space<vmem>>, %arg12: memref<8x1xf32, #tpu.memory_space<vmem>>, %arg13: memref<1x1xf32, #tpu.memory_space<vmem>>, %arg14: memref<2x8xf32, #tpu.memory_space<vmem>>, %arg15: memref<2x1xf32, #tpu.memory_space<vmem>>) attributes {dimension_semantics = [], scalar_prefetch = 0 : i64, scratch_operands = 0 : i64, tpu.core_type = #tpu.core_type<tc>} {
    %c0 = arith.constant 0 : index
    %c0_0 = arith.constant 0 : index
    %0 = vector.load %arg2[%c0, %c0_0] : memref<16x64xf32, #tpu.memory_space<vmem>>, vector<16x64xf32>
    %c0_1 = arith.constant 0 : index
    %c0_2 = arith.constant 0 : index
    %1 = vector.load %arg4[%c0_1, %c0_2] : memref<32x64xf32, #tpu.memory_space<vmem>>, vector<32x64xf32>
    %c0_3 = arith.constant 0 : index
    %c0_4 = arith.constant 0 : index
    %2 = vector.load %arg0[%c0_3, %c0_4] : memref<16x4xf32, #tpu.memory_space<vmem>>, vector<16x4xf32>
    %c0_5 = arith.constant 0 : index
    %c0_6 = arith.constant 0 : index
    %3 = vector.load %arg1[%c0_5, %c0_6] : memref<4x64xf32, #tpu.memory_space<vmem>>, vector<4x64xf32>
    %cst = arith.constant dense<0.000000e+00> : vector<16x64xf32>
    %4 = tpu.matmul %2, %3, %cst {dimension_numbers = #tpu.dot_dimension_numbers<[1], [0], [0], [1], [0, 0, 1, 1], [], []>} : vector<16x4xf32>, vector<4x64xf32>, vector<16x64xf32> -> vector<16x64xf32>
    %c0_7 = arith.constant 0 : index
    %c0_8 = arith.constant 0 : index
    %5 = vector.load %arg3[%c0_7, %c0_8] : memref<1x64xf32, #tpu.memory_space<vmem>>, vector<1x64xf32>
    %6 = vector.shape_cast %5 : vector<1x64xf32> to vector<1x64xf32>
    %7 = vector.broadcast %6 : vector<1x64xf32> to vector<16x64xf32>
    %8 = arith.addf %4, %7 : vector<16x64xf32>
    %c0_9 = arith.constant 0 : index
    %c0_10 = arith.constant 0 : index
    %9 = vector.load %arg5[%c0_9, %c0_10] : memref<1x64xf32, #tpu.memory_space<vmem>>, vector<1x64xf32>
    %10 = vector.shape_cast %9 : vector<1x64xf32> to vector<1x64xf32>
    %11 = vector.broadcast %10 : vector<1x64xf32> to vector<2x64xf32>
    %cst_11 = arith.constant 0.000000e+00 : f32
    %12 = vector.broadcast %cst_11 : f32 to vector<2x16xf32>
    %cst_12 = arith.constant 0.000000e+00 : f32
    %13 = vector.broadcast %cst_12 : f32 to vector<2x16xf32>
    %cst_13 = arith.constant 0.000000e+00 : f32
    %14 = vector.broadcast %cst_13 : f32 to vector<2x16xf32>
    %cst_14 = arith.constant 0.000000e+00 : f32
    %15 = vector.broadcast %cst_14 : f32 to vector<2x16xf32>
    %16 = vector.extract_strided_slice %8 {offsets = [0, 0], sizes = [2, 64], strides = [1, 1]} : vector<16x64xf32> to vector<2x64xf32>
    %cst_15 = arith.constant dense<0.000000e+00> : vector<2x64xf32>
    %17 = tpu.matmul %12, %0, %cst_15 {dimension_numbers = #tpu.dot_dimension_numbers<[1], [0], [0], [1], [0, 0, 1, 1], [], []>} : vector<2x16xf32>, vector<16x64xf32>, vector<2x64xf32> -> vector<2x64xf32>
    %18 = arith.addf %16, %17 : vector<2x64xf32>
    %19 = arith.negf %18 : vector<2x64xf32>
    %20 = math.exp %19 : vector<2x64xf32>
    %cst_16 = arith.constant 1.000000e+00 : f32
    %21 = vector.broadcast %cst_16 : f32 to vector<2x64xf32>
    %22 = arith.addf %21, %20 : vector<2x64xf32>
    %23 = arith.divf %21, %22 : vector<2x64xf32>
    %24 = math.tanh %18 : vector<2x64xf32>
    %25 = vector.extract_strided_slice %23 {offsets = [0, 0], sizes = [2, 16], strides = [1, 1]} : vector<2x64xf32> to vector<2x16xf32>
    %26 = vector.extract_strided_slice %23 {offsets = [0, 16], sizes = [2, 16], strides = [1, 1]} : vector<2x64xf32> to vector<2x16xf32>
    %27 = vector.extract_strided_slice %24 {offsets = [0, 32], sizes = [2, 16], strides = [1, 1]} : vector<2x64xf32> to vector<2x16xf32>
    %28 = vector.extract_strided_slice %23 {offsets = [0, 48], sizes = [2, 16], strides = [1, 1]} : vector<2x64xf32> to vector<2x16xf32>
    %29 = arith.mulf %26, %13 : vector<2x16xf32>
    %30 = arith.mulf %25, %27 : vector<2x16xf32>
    %31 = arith.addf %29, %30 : vector<2x16xf32>
    %32 = math.tanh %31 : vector<2x16xf32>
    %33 = arith.mulf %28, %32 : vector<2x16xf32>
    %34 = tpu.concatenate %33, %14 in 1 : vector<2x16xf32>, vector<2x16xf32> -> vector<2x32xf32>
    %cst_17 = arith.constant dense<0.000000e+00> : vector<2x64xf32>
    %35 = tpu.matmul %34, %1, %cst_17 {dimension_numbers = #tpu.dot_dimension_numbers<[1], [0], [0], [1], [0, 0, 1, 1], [], []>} : vector<2x32xf32>, vector<32x64xf32>, vector<2x64xf32> -> vector<2x64xf32>
    %36 = arith.addf %35, %11 : vector<2x64xf32>
    %37 = arith.negf %36 : vector<2x64xf32>
    %38 = math.exp %37 : vector<2x64xf32>
    %cst_18 = arith.constant 1.000000e+00 : f32
    %39 = vector.broadcast %cst_18 : f32 to vector<2x64xf32>
    %40 = arith.addf %39, %38 : vector<2x64xf32>
    %41 = arith.divf %39, %40 : vector<2x64xf32>
    %42 = math.tanh %36 : vector<2x64xf32>
    %43 = vector.extract_strided_slice %41 {offsets = [0, 0], sizes = [2, 16], strides = [1, 1]} : vector<2x64xf32> to vector<2x16xf32>
    %44 = vector.extract_strided_slice %41 {offsets = [0, 16], sizes = [2, 16], strides = [1, 1]} : vector<2x64xf32> to vector<2x16xf32>
    %45 = vector.extract_strided_slice %42 {offsets = [0, 32], sizes = [2, 16], strides = [1, 1]} : vector<2x64xf32> to vector<2x16xf32>
    %46 = vector.extract_strided_slice %41 {offsets = [0, 48], sizes = [2, 16], strides = [1, 1]} : vector<2x64xf32> to vector<2x16xf32>
    %47 = arith.mulf %44, %15 : vector<2x16xf32>
    %48 = arith.mulf %43, %45 : vector<2x16xf32>
    %49 = arith.addf %47, %48 : vector<2x16xf32>
    %50 = math.tanh %49 : vector<2x16xf32>
    %51 = arith.mulf %46, %50 : vector<2x16xf32>
    %52 = vector.extract_strided_slice %8 {offsets = [2, 0], sizes = [2, 64], strides = [1, 1]} : vector<16x64xf32> to vector<2x64xf32>
    %cst_19 = arith.constant dense<0.000000e+00> : vector<2x64xf32>
    %53 = tpu.matmul %33, %0, %cst_19 {dimension_numbers = #tpu.dot_dimension_numbers<[1], [0], [0], [1], [0, 0, 1, 1], [], []>} : vector<2x16xf32>, vector<16x64xf32>, vector<2x64xf32> -> vector<2x64xf32>
    %54 = arith.addf %52, %53 : vector<2x64xf32>
    %55 = arith.negf %54 : vector<2x64xf32>
    %56 = math.exp %55 : vector<2x64xf32>
    %cst_20 = arith.constant 1.000000e+00 : f32
    %57 = vector.broadcast %cst_20 : f32 to vector<2x64xf32>
    %58 = arith.addf %57, %56 : vector<2x64xf32>
    %59 = arith.divf %57, %58 : vector<2x64xf32>
    %60 = math.tanh %54 : vector<2x64xf32>
    %61 = vector.extract_strided_slice %59 {offsets = [0, 0], sizes = [2, 16], strides = [1, 1]} : vector<2x64xf32> to vector<2x16xf32>
    %62 = vector.extract_strided_slice %59 {offsets = [0, 16], sizes = [2, 16], strides = [1, 1]} : vector<2x64xf32> to vector<2x16xf32>
    %63 = vector.extract_strided_slice %60 {offsets = [0, 32], sizes = [2, 16], strides = [1, 1]} : vector<2x64xf32> to vector<2x16xf32>
    %64 = vector.extract_strided_slice %59 {offsets = [0, 48], sizes = [2, 16], strides = [1, 1]} : vector<2x64xf32> to vector<2x16xf32>
    %65 = arith.mulf %62, %31 : vector<2x16xf32>
    %66 = arith.mulf %61, %63 : vector<2x16xf32>
    %67 = arith.addf %65, %66 : vector<2x16xf32>
    %68 = math.tanh %67 : vector<2x16xf32>
    %69 = arith.mulf %64, %68 : vector<2x16xf32>
    %70 = tpu.concatenate %69, %51 in 1 : vector<2x16xf32>, vector<2x16xf32> -> vector<2x32xf32>
    %cst_21 = arith.constant dense<0.000000e+00> : vector<2x64xf32>
    %71 = tpu.matmul %70, %1, %cst_21 {dimension_numbers = #tpu.dot_dimension_numbers<[1], [0], [0], [1], [0, 0, 1, 1], [], []>} : vector<2x32xf32>, vector<32x64xf32>, vector<2x64xf32> -> vector<2x64xf32>
    %72 = arith.addf %71, %11 : vector<2x64xf32>
    %73 = arith.negf %72 : vector<2x64xf32>
    %74 = math.exp %73 : vector<2x64xf32>
    %cst_22 = arith.constant 1.000000e+00 : f32
    %75 = vector.broadcast %cst_22 : f32 to vector<2x64xf32>
    %76 = arith.addf %75, %74 : vector<2x64xf32>
    %77 = arith.divf %75, %76 : vector<2x64xf32>
    %78 = math.tanh %72 : vector<2x64xf32>
    %79 = vector.extract_strided_slice %77 {offsets = [0, 0], sizes = [2, 16], strides = [1, 1]} : vector<2x64xf32> to vector<2x16xf32>
    %80 = vector.extract_strided_slice %77 {offsets = [0, 16], sizes = [2, 16], strides = [1, 1]} : vector<2x64xf32> to vector<2x16xf32>
    %81 = vector.extract_strided_slice %78 {offsets = [0, 32], sizes = [2, 16], strides = [1, 1]} : vector<2x64xf32> to vector<2x16xf32>
    %82 = vector.extract_strided_slice %77 {offsets = [0, 48], sizes = [2, 16], strides = [1, 1]} : vector<2x64xf32> to vector<2x16xf32>
    %83 = arith.mulf %80, %49 : vector<2x16xf32>
    %84 = arith.mulf %79, %81 : vector<2x16xf32>
    %85 = arith.addf %83, %84 : vector<2x16xf32>
    %86 = math.tanh %85 : vector<2x16xf32>
    %87 = arith.mulf %82, %86 : vector<2x16xf32>
    %88 = vector.extract_strided_slice %8 {offsets = [4, 0], sizes = [2, 64], strides = [1, 1]} : vector<16x64xf32> to vector<2x64xf32>
    %cst_23 = arith.constant dense<0.000000e+00> : vector<2x64xf32>
    %89 = tpu.matmul %69, %0, %cst_23 {dimension_numbers = #tpu.dot_dimension_numbers<[1], [0], [0], [1], [0, 0, 1, 1], [], []>} : vector<2x16xf32>, vector<16x64xf32>, vector<2x64xf32> -> vector<2x64xf32>
    %90 = arith.addf %88, %89 : vector<2x64xf32>
    %91 = arith.negf %90 : vector<2x64xf32>
    %92 = math.exp %91 : vector<2x64xf32>
    %cst_24 = arith.constant 1.000000e+00 : f32
    %93 = vector.broadcast %cst_24 : f32 to vector<2x64xf32>
    %94 = arith.addf %93, %92 : vector<2x64xf32>
    %95 = arith.divf %93, %94 : vector<2x64xf32>
    %96 = math.tanh %90 : vector<2x64xf32>
    %97 = vector.extract_strided_slice %95 {offsets = [0, 0], sizes = [2, 16], strides = [1, 1]} : vector<2x64xf32> to vector<2x16xf32>
    %98 = vector.extract_strided_slice %95 {offsets = [0, 16], sizes = [2, 16], strides = [1, 1]} : vector<2x64xf32> to vector<2x16xf32>
    %99 = vector.extract_strided_slice %96 {offsets = [0, 32], sizes = [2, 16], strides = [1, 1]} : vector<2x64xf32> to vector<2x16xf32>
    %100 = vector.extract_strided_slice %95 {offsets = [0, 48], sizes = [2, 16], strides = [1, 1]} : vector<2x64xf32> to vector<2x16xf32>
    %101 = arith.mulf %98, %67 : vector<2x16xf32>
    %102 = arith.mulf %97, %99 : vector<2x16xf32>
    %103 = arith.addf %101, %102 : vector<2x16xf32>
    %104 = math.tanh %103 : vector<2x16xf32>
    %105 = arith.mulf %100, %104 : vector<2x16xf32>
    %106 = tpu.concatenate %105, %87 in 1 : vector<2x16xf32>, vector<2x16xf32> -> vector<2x32xf32>
    %cst_25 = arith.constant dense<0.000000e+00> : vector<2x64xf32>
    %107 = tpu.matmul %106, %1, %cst_25 {dimension_numbers = #tpu.dot_dimension_numbers<[1], [0], [0], [1], [0, 0, 1, 1], [], []>} : vector<2x32xf32>, vector<32x64xf32>, vector<2x64xf32> -> vector<2x64xf32>
    %108 = arith.addf %107, %11 : vector<2x64xf32>
    %109 = arith.negf %108 : vector<2x64xf32>
    %110 = math.exp %109 : vector<2x64xf32>
    %cst_26 = arith.constant 1.000000e+00 : f32
    %111 = vector.broadcast %cst_26 : f32 to vector<2x64xf32>
    %112 = arith.addf %111, %110 : vector<2x64xf32>
    %113 = arith.divf %111, %112 : vector<2x64xf32>
    %114 = math.tanh %108 : vector<2x64xf32>
    %115 = vector.extract_strided_slice %113 {offsets = [0, 0], sizes = [2, 16], strides = [1, 1]} : vector<2x64xf32> to vector<2x16xf32>
    %116 = vector.extract_strided_slice %113 {offsets = [0, 16], sizes = [2, 16], strides = [1, 1]} : vector<2x64xf32> to vector<2x16xf32>
    %117 = vector.extract_strided_slice %114 {offsets = [0, 32], sizes = [2, 16], strides = [1, 1]} : vector<2x64xf32> to vector<2x16xf32>
    %118 = vector.extract_strided_slice %113 {offsets = [0, 48], sizes = [2, 16], strides = [1, 1]} : vector<2x64xf32> to vector<2x16xf32>
    %119 = arith.mulf %116, %85 : vector<2x16xf32>
    %120 = arith.mulf %115, %117 : vector<2x16xf32>
    %121 = arith.addf %119, %120 : vector<2x16xf32>
    %122 = math.tanh %121 : vector<2x16xf32>
    %123 = arith.mulf %118, %122 : vector<2x16xf32>
    %124 = vector.extract_strided_slice %8 {offsets = [6, 0], sizes = [2, 64], strides = [1, 1]} : vector<16x64xf32> to vector<2x64xf32>
    %cst_27 = arith.constant dense<0.000000e+00> : vector<2x64xf32>
    %125 = tpu.matmul %105, %0, %cst_27 {dimension_numbers = #tpu.dot_dimension_numbers<[1], [0], [0], [1], [0, 0, 1, 1], [], []>} : vector<2x16xf32>, vector<16x64xf32>, vector<2x64xf32> -> vector<2x64xf32>
    %126 = arith.addf %124, %125 : vector<2x64xf32>
    %127 = arith.negf %126 : vector<2x64xf32>
    %128 = math.exp %127 : vector<2x64xf32>
    %cst_28 = arith.constant 1.000000e+00 : f32
    %129 = vector.broadcast %cst_28 : f32 to vector<2x64xf32>
    %130 = arith.addf %129, %128 : vector<2x64xf32>
    %131 = arith.divf %129, %130 : vector<2x64xf32>
    %132 = math.tanh %126 : vector<2x64xf32>
    %133 = vector.extract_strided_slice %131 {offsets = [0, 0], sizes = [2, 16], strides = [1, 1]} : vector<2x64xf32> to vector<2x16xf32>
    %134 = vector.extract_strided_slice %131 {offsets = [0, 16], sizes = [2, 16], strides = [1, 1]} : vector<2x64xf32> to vector<2x16xf32>
    %135 = vector.extract_strided_slice %132 {offsets = [0, 32], sizes = [2, 16], strides = [1, 1]} : vector<2x64xf32> to vector<2x16xf32>
    %136 = vector.extract_strided_slice %131 {offsets = [0, 48], sizes = [2, 16], strides = [1, 1]} : vector<2x64xf32> to vector<2x16xf32>
    %137 = arith.mulf %134, %103 : vector<2x16xf32>
    %138 = arith.mulf %133, %135 : vector<2x16xf32>
    %139 = arith.addf %137, %138 : vector<2x16xf32>
    %140 = math.tanh %139 : vector<2x16xf32>
    %141 = arith.mulf %136, %140 : vector<2x16xf32>
    %142 = tpu.concatenate %141, %123 in 1 : vector<2x16xf32>, vector<2x16xf32> -> vector<2x32xf32>
    %cst_29 = arith.constant dense<0.000000e+00> : vector<2x64xf32>
    %143 = tpu.matmul %142, %1, %cst_29 {dimension_numbers = #tpu.dot_dimension_numbers<[1], [0], [0], [1], [0, 0, 1, 1], [], []>} : vector<2x32xf32>, vector<32x64xf32>, vector<2x64xf32> -> vector<2x64xf32>
    %144 = arith.addf %143, %11 : vector<2x64xf32>
    %145 = arith.negf %144 : vector<2x64xf32>
    %146 = math.exp %145 : vector<2x64xf32>
    %cst_30 = arith.constant 1.000000e+00 : f32
    %147 = vector.broadcast %cst_30 : f32 to vector<2x64xf32>
    %148 = arith.addf %147, %146 : vector<2x64xf32>
    %149 = arith.divf %147, %148 : vector<2x64xf32>
    %150 = math.tanh %144 : vector<2x64xf32>
    %151 = vector.extract_strided_slice %149 {offsets = [0, 0], sizes = [2, 16], strides = [1, 1]} : vector<2x64xf32> to vector<2x16xf32>
    %152 = vector.extract_strided_slice %149 {offsets = [0, 16], sizes = [2, 16], strides = [1, 1]} : vector<2x64xf32> to vector<2x16xf32>
    %153 = vector.extract_strided_slice %150 {offsets = [0, 32], sizes = [2, 16], strides = [1, 1]} : vector<2x64xf32> to vector<2x16xf32>
    %154 = vector.extract_strided_slice %149 {offsets = [0, 48], sizes = [2, 16], strides = [1, 1]} : vector<2x64xf32> to vector<2x16xf32>
    %155 = arith.mulf %152, %121 : vector<2x16xf32>
    %156 = arith.mulf %151, %153 : vector<2x16xf32>
    %157 = arith.addf %155, %156 : vector<2x16xf32>
    %158 = math.tanh %157 : vector<2x16xf32>
    %159 = arith.mulf %154, %158 : vector<2x16xf32>
    %160 = vector.extract_strided_slice %8 {offsets = [8, 0], sizes = [2, 64], strides = [1, 1]} : vector<16x64xf32> to vector<2x64xf32>
    %cst_31 = arith.constant dense<0.000000e+00> : vector<2x64xf32>
    %161 = tpu.matmul %141, %0, %cst_31 {dimension_numbers = #tpu.dot_dimension_numbers<[1], [0], [0], [1], [0, 0, 1, 1], [], []>} : vector<2x16xf32>, vector<16x64xf32>, vector<2x64xf32> -> vector<2x64xf32>
    %162 = arith.addf %160, %161 : vector<2x64xf32>
    %163 = arith.negf %162 : vector<2x64xf32>
    %164 = math.exp %163 : vector<2x64xf32>
    %cst_32 = arith.constant 1.000000e+00 : f32
    %165 = vector.broadcast %cst_32 : f32 to vector<2x64xf32>
    %166 = arith.addf %165, %164 : vector<2x64xf32>
    %167 = arith.divf %165, %166 : vector<2x64xf32>
    %168 = math.tanh %162 : vector<2x64xf32>
    %169 = vector.extract_strided_slice %167 {offsets = [0, 0], sizes = [2, 16], strides = [1, 1]} : vector<2x64xf32> to vector<2x16xf32>
    %170 = vector.extract_strided_slice %167 {offsets = [0, 16], sizes = [2, 16], strides = [1, 1]} : vector<2x64xf32> to vector<2x16xf32>
    %171 = vector.extract_strided_slice %168 {offsets = [0, 32], sizes = [2, 16], strides = [1, 1]} : vector<2x64xf32> to vector<2x16xf32>
    %172 = vector.extract_strided_slice %167 {offsets = [0, 48], sizes = [2, 16], strides = [1, 1]} : vector<2x64xf32> to vector<2x16xf32>
    %173 = arith.mulf %170, %139 : vector<2x16xf32>
    %174 = arith.mulf %169, %171 : vector<2x16xf32>
    %175 = arith.addf %173, %174 : vector<2x16xf32>
    %176 = math.tanh %175 : vector<2x16xf32>
    %177 = arith.mulf %172, %176 : vector<2x16xf32>
    %178 = tpu.concatenate %177, %159 in 1 : vector<2x16xf32>, vector<2x16xf32> -> vector<2x32xf32>
    %cst_33 = arith.constant dense<0.000000e+00> : vector<2x64xf32>
    %179 = tpu.matmul %178, %1, %cst_33 {dimension_numbers = #tpu.dot_dimension_numbers<[1], [0], [0], [1], [0, 0, 1, 1], [], []>} : vector<2x32xf32>, vector<32x64xf32>, vector<2x64xf32> -> vector<2x64xf32>
    %180 = arith.addf %179, %11 : vector<2x64xf32>
    %181 = arith.negf %180 : vector<2x64xf32>
    %182 = math.exp %181 : vector<2x64xf32>
    %cst_34 = arith.constant 1.000000e+00 : f32
    %183 = vector.broadcast %cst_34 : f32 to vector<2x64xf32>
    %184 = arith.addf %183, %182 : vector<2x64xf32>
    %185 = arith.divf %183, %184 : vector<2x64xf32>
    %186 = math.tanh %180 : vector<2x64xf32>
    %187 = vector.extract_strided_slice %185 {offsets = [0, 0], sizes = [2, 16], strides = [1, 1]} : vector<2x64xf32> to vector<2x16xf32>
    %188 = vector.extract_strided_slice %185 {offsets = [0, 16], sizes = [2, 16], strides = [1, 1]} : vector<2x64xf32> to vector<2x16xf32>
    %189 = vector.extract_strided_slice %186 {offsets = [0, 32], sizes = [2, 16], strides = [1, 1]} : vector<2x64xf32> to vector<2x16xf32>
    %190 = vector.extract_strided_slice %185 {offsets = [0, 48], sizes = [2, 16], strides = [1, 1]} : vector<2x64xf32> to vector<2x16xf32>
    %191 = arith.mulf %188, %157 : vector<2x16xf32>
    %192 = arith.mulf %187, %189 : vector<2x16xf32>
    %193 = arith.addf %191, %192 : vector<2x16xf32>
    %194 = math.tanh %193 : vector<2x16xf32>
    %195 = arith.mulf %190, %194 : vector<2x16xf32>
    %196 = vector.extract_strided_slice %8 {offsets = [10, 0], sizes = [2, 64], strides = [1, 1]} : vector<16x64xf32> to vector<2x64xf32>
    %cst_35 = arith.constant dense<0.000000e+00> : vector<2x64xf32>
    %197 = tpu.matmul %177, %0, %cst_35 {dimension_numbers = #tpu.dot_dimension_numbers<[1], [0], [0], [1], [0, 0, 1, 1], [], []>} : vector<2x16xf32>, vector<16x64xf32>, vector<2x64xf32> -> vector<2x64xf32>
    %198 = arith.addf %196, %197 : vector<2x64xf32>
    %199 = arith.negf %198 : vector<2x64xf32>
    %200 = math.exp %199 : vector<2x64xf32>
    %cst_36 = arith.constant 1.000000e+00 : f32
    %201 = vector.broadcast %cst_36 : f32 to vector<2x64xf32>
    %202 = arith.addf %201, %200 : vector<2x64xf32>
    %203 = arith.divf %201, %202 : vector<2x64xf32>
    %204 = math.tanh %198 : vector<2x64xf32>
    %205 = vector.extract_strided_slice %203 {offsets = [0, 0], sizes = [2, 16], strides = [1, 1]} : vector<2x64xf32> to vector<2x16xf32>
    %206 = vector.extract_strided_slice %203 {offsets = [0, 16], sizes = [2, 16], strides = [1, 1]} : vector<2x64xf32> to vector<2x16xf32>
    %207 = vector.extract_strided_slice %204 {offsets = [0, 32], sizes = [2, 16], strides = [1, 1]} : vector<2x64xf32> to vector<2x16xf32>
    %208 = vector.extract_strided_slice %203 {offsets = [0, 48], sizes = [2, 16], strides = [1, 1]} : vector<2x64xf32> to vector<2x16xf32>
    %209 = arith.mulf %206, %175 : vector<2x16xf32>
    %210 = arith.mulf %205, %207 : vector<2x16xf32>
    %211 = arith.addf %209, %210 : vector<2x16xf32>
    %212 = math.tanh %211 : vector<2x16xf32>
    %213 = arith.mulf %208, %212 : vector<2x16xf32>
    %214 = tpu.concatenate %213, %195 in 1 : vector<2x16xf32>, vector<2x16xf32> -> vector<2x32xf32>
    %cst_37 = arith.constant dense<0.000000e+00> : vector<2x64xf32>
    %215 = tpu.matmul %214, %1, %cst_37 {dimension_numbers = #tpu.dot_dimension_numbers<[1], [0], [0], [1], [0, 0, 1, 1], [], []>} : vector<2x32xf32>, vector<32x64xf32>, vector<2x64xf32> -> vector<2x64xf32>
    %216 = arith.addf %215, %11 : vector<2x64xf32>
    %217 = arith.negf %216 : vector<2x64xf32>
    %218 = math.exp %217 : vector<2x64xf32>
    %cst_38 = arith.constant 1.000000e+00 : f32
    %219 = vector.broadcast %cst_38 : f32 to vector<2x64xf32>
    %220 = arith.addf %219, %218 : vector<2x64xf32>
    %221 = arith.divf %219, %220 : vector<2x64xf32>
    %222 = math.tanh %216 : vector<2x64xf32>
    %223 = vector.extract_strided_slice %221 {offsets = [0, 0], sizes = [2, 16], strides = [1, 1]} : vector<2x64xf32> to vector<2x16xf32>
    %224 = vector.extract_strided_slice %221 {offsets = [0, 16], sizes = [2, 16], strides = [1, 1]} : vector<2x64xf32> to vector<2x16xf32>
    %225 = vector.extract_strided_slice %222 {offsets = [0, 32], sizes = [2, 16], strides = [1, 1]} : vector<2x64xf32> to vector<2x16xf32>
    %226 = vector.extract_strided_slice %221 {offsets = [0, 48], sizes = [2, 16], strides = [1, 1]} : vector<2x64xf32> to vector<2x16xf32>
    %227 = arith.mulf %224, %193 : vector<2x16xf32>
    %228 = arith.mulf %223, %225 : vector<2x16xf32>
    %229 = arith.addf %227, %228 : vector<2x16xf32>
    %230 = math.tanh %229 : vector<2x16xf32>
    %231 = arith.mulf %226, %230 : vector<2x16xf32>
    %232 = vector.extract_strided_slice %8 {offsets = [12, 0], sizes = [2, 64], strides = [1, 1]} : vector<16x64xf32> to vector<2x64xf32>
    %cst_39 = arith.constant dense<0.000000e+00> : vector<2x64xf32>
    %233 = tpu.matmul %213, %0, %cst_39 {dimension_numbers = #tpu.dot_dimension_numbers<[1], [0], [0], [1], [0, 0, 1, 1], [], []>} : vector<2x16xf32>, vector<16x64xf32>, vector<2x64xf32> -> vector<2x64xf32>
    %234 = arith.addf %232, %233 : vector<2x64xf32>
    %235 = arith.negf %234 : vector<2x64xf32>
    %236 = math.exp %235 : vector<2x64xf32>
    %cst_40 = arith.constant 1.000000e+00 : f32
    %237 = vector.broadcast %cst_40 : f32 to vector<2x64xf32>
    %238 = arith.addf %237, %236 : vector<2x64xf32>
    %239 = arith.divf %237, %238 : vector<2x64xf32>
    %240 = math.tanh %234 : vector<2x64xf32>
    %241 = vector.extract_strided_slice %239 {offsets = [0, 0], sizes = [2, 16], strides = [1, 1]} : vector<2x64xf32> to vector<2x16xf32>
    %242 = vector.extract_strided_slice %239 {offsets = [0, 16], sizes = [2, 16], strides = [1, 1]} : vector<2x64xf32> to vector<2x16xf32>
    %243 = vector.extract_strided_slice %240 {offsets = [0, 32], sizes = [2, 16], strides = [1, 1]} : vector<2x64xf32> to vector<2x16xf32>
    %244 = vector.extract_strided_slice %239 {offsets = [0, 48], sizes = [2, 16], strides = [1, 1]} : vector<2x64xf32> to vector<2x16xf32>
    %245 = arith.mulf %242, %211 : vector<2x16xf32>
    %246 = arith.mulf %241, %243 : vector<2x16xf32>
    %247 = arith.addf %245, %246 : vector<2x16xf32>
    %248 = math.tanh %247 : vector<2x16xf32>
    %249 = arith.mulf %244, %248 : vector<2x16xf32>
    %250 = tpu.concatenate %249, %231 in 1 : vector<2x16xf32>, vector<2x16xf32> -> vector<2x32xf32>
    %cst_41 = arith.constant dense<0.000000e+00> : vector<2x64xf32>
    %251 = tpu.matmul %250, %1, %cst_41 {dimension_numbers = #tpu.dot_dimension_numbers<[1], [0], [0], [1], [0, 0, 1, 1], [], []>} : vector<2x32xf32>, vector<32x64xf32>, vector<2x64xf32> -> vector<2x64xf32>
    %252 = arith.addf %251, %11 : vector<2x64xf32>
    %253 = arith.negf %252 : vector<2x64xf32>
    %254 = math.exp %253 : vector<2x64xf32>
    %cst_42 = arith.constant 1.000000e+00 : f32
    %255 = vector.broadcast %cst_42 : f32 to vector<2x64xf32>
    %256 = arith.addf %255, %254 : vector<2x64xf32>
    %257 = arith.divf %255, %256 : vector<2x64xf32>
    %258 = math.tanh %252 : vector<2x64xf32>
    %259 = vector.extract_strided_slice %257 {offsets = [0, 0], sizes = [2, 16], strides = [1, 1]} : vector<2x64xf32> to vector<2x16xf32>
    %260 = vector.extract_strided_slice %257 {offsets = [0, 16], sizes = [2, 16], strides = [1, 1]} : vector<2x64xf32> to vector<2x16xf32>
    %261 = vector.extract_strided_slice %258 {offsets = [0, 32], sizes = [2, 16], strides = [1, 1]} : vector<2x64xf32> to vector<2x16xf32>
    %262 = vector.extract_strided_slice %257 {offsets = [0, 48], sizes = [2, 16], strides = [1, 1]} : vector<2x64xf32> to vector<2x16xf32>
    %263 = arith.mulf %260, %229 : vector<2x16xf32>
    %264 = arith.mulf %259, %261 : vector<2x16xf32>
    %265 = arith.addf %263, %264 : vector<2x16xf32>
    %266 = math.tanh %265 : vector<2x16xf32>
    %267 = arith.mulf %262, %266 : vector<2x16xf32>
    %268 = vector.extract_strided_slice %8 {offsets = [14, 0], sizes = [2, 64], strides = [1, 1]} : vector<16x64xf32> to vector<2x64xf32>
    %cst_43 = arith.constant dense<0.000000e+00> : vector<2x64xf32>
    %269 = tpu.matmul %249, %0, %cst_43 {dimension_numbers = #tpu.dot_dimension_numbers<[1], [0], [0], [1], [0, 0, 1, 1], [], []>} : vector<2x16xf32>, vector<16x64xf32>, vector<2x64xf32> -> vector<2x64xf32>
    %270 = arith.addf %268, %269 : vector<2x64xf32>
    %271 = arith.negf %270 : vector<2x64xf32>
    %272 = math.exp %271 : vector<2x64xf32>
    %cst_44 = arith.constant 1.000000e+00 : f32
    %273 = vector.broadcast %cst_44 : f32 to vector<2x64xf32>
    %274 = arith.addf %273, %272 : vector<2x64xf32>
    %275 = arith.divf %273, %274 : vector<2x64xf32>
    %276 = math.tanh %270 : vector<2x64xf32>
    %277 = vector.extract_strided_slice %275 {offsets = [0, 0], sizes = [2, 16], strides = [1, 1]} : vector<2x64xf32> to vector<2x16xf32>
    %278 = vector.extract_strided_slice %275 {offsets = [0, 16], sizes = [2, 16], strides = [1, 1]} : vector<2x64xf32> to vector<2x16xf32>
    %279 = vector.extract_strided_slice %276 {offsets = [0, 32], sizes = [2, 16], strides = [1, 1]} : vector<2x64xf32> to vector<2x16xf32>
    %280 = vector.extract_strided_slice %275 {offsets = [0, 48], sizes = [2, 16], strides = [1, 1]} : vector<2x64xf32> to vector<2x16xf32>
    %281 = arith.mulf %278, %247 : vector<2x16xf32>
    %282 = arith.mulf %277, %279 : vector<2x16xf32>
    %283 = arith.addf %281, %282 : vector<2x16xf32>
    %284 = math.tanh %283 : vector<2x16xf32>
    %285 = arith.mulf %280, %284 : vector<2x16xf32>
    %286 = tpu.concatenate %285, %267 in 1 : vector<2x16xf32>, vector<2x16xf32> -> vector<2x32xf32>
    %cst_45 = arith.constant dense<0.000000e+00> : vector<2x64xf32>
    %287 = tpu.matmul %286, %1, %cst_45 {dimension_numbers = #tpu.dot_dimension_numbers<[1], [0], [0], [1], [0, 0, 1, 1], [], []>} : vector<2x32xf32>, vector<32x64xf32>, vector<2x64xf32> -> vector<2x64xf32>
    %288 = arith.addf %287, %11 : vector<2x64xf32>
    %289 = arith.negf %288 : vector<2x64xf32>
    %290 = math.exp %289 : vector<2x64xf32>
    %cst_46 = arith.constant 1.000000e+00 : f32
    %291 = vector.broadcast %cst_46 : f32 to vector<2x64xf32>
    %292 = arith.addf %291, %290 : vector<2x64xf32>
    %293 = arith.divf %291, %292 : vector<2x64xf32>
    %294 = math.tanh %288 : vector<2x64xf32>
    %295 = vector.extract_strided_slice %293 {offsets = [0, 0], sizes = [2, 16], strides = [1, 1]} : vector<2x64xf32> to vector<2x16xf32>
    %296 = vector.extract_strided_slice %293 {offsets = [0, 16], sizes = [2, 16], strides = [1, 1]} : vector<2x64xf32> to vector<2x16xf32>
    %297 = vector.extract_strided_slice %294 {offsets = [0, 32], sizes = [2, 16], strides = [1, 1]} : vector<2x64xf32> to vector<2x16xf32>
    %298 = vector.extract_strided_slice %293 {offsets = [0, 48], sizes = [2, 16], strides = [1, 1]} : vector<2x64xf32> to vector<2x16xf32>
    %299 = arith.mulf %296, %265 : vector<2x16xf32>
    %300 = arith.mulf %295, %297 : vector<2x16xf32>
    %301 = arith.addf %299, %300 : vector<2x16xf32>
    %302 = math.tanh %301 : vector<2x16xf32>
    %303 = arith.mulf %298, %302 : vector<2x16xf32>
    %c0_47 = arith.constant 0 : index
    %c0_48 = arith.constant 0 : index
    %304 = vector.load %arg6[%c0_47, %c0_48] : memref<16x64xf32, #tpu.memory_space<vmem>>, vector<16x64xf32>
    %cst_49 = arith.constant dense<0.000000e+00> : vector<2x64xf32>
    %305 = tpu.matmul %303, %304, %cst_49 {dimension_numbers = #tpu.dot_dimension_numbers<[1], [0], [0], [1], [0, 0, 1, 1], [], []>} : vector<2x16xf32>, vector<16x64xf32>, vector<2x64xf32> -> vector<2x64xf32>
    %c0_50 = arith.constant 0 : index
    %c0_51 = arith.constant 0 : index
    %306 = vector.load %arg7[%c0_50, %c0_51] : memref<1x64xf32, #tpu.memory_space<vmem>>, vector<1x64xf32>
    %307 = vector.broadcast %306 : vector<1x64xf32> to vector<2x64xf32>
    %308 = arith.addf %305, %307 : vector<2x64xf32>
    %cst_52 = arith.constant 0.000000e+00 : f32
    %309 = vector.broadcast %cst_52 : f32 to vector<2x64xf32>
    %310 = arith.maximumf %308, %309 : vector<2x64xf32>
    %c0_53 = arith.constant 0 : index
    %c0_54 = arith.constant 0 : index
    %311 = vector.load %arg8[%c0_53, %c0_54] : memref<64x64xf32, #tpu.memory_space<vmem>>, vector<64x64xf32>
    %cst_55 = arith.constant dense<0.000000e+00> : vector<2x64xf32>
    %312 = tpu.matmul %310, %311, %cst_55 {dimension_numbers = #tpu.dot_dimension_numbers<[1], [0], [0], [1], [0, 0, 1, 1], [], []>} : vector<2x64xf32>, vector<64x64xf32>, vector<2x64xf32> -> vector<2x64xf32>
    %c0_56 = arith.constant 0 : index
    %c0_57 = arith.constant 0 : index
    %313 = vector.load %arg9[%c0_56, %c0_57] : memref<1x64xf32, #tpu.memory_space<vmem>>, vector<1x64xf32>
    %314 = vector.broadcast %313 : vector<1x64xf32> to vector<2x64xf32>
    %315 = arith.addf %312, %314 : vector<2x64xf32>
    %cst_58 = arith.constant 0.000000e+00 : f32
    %316 = vector.broadcast %cst_58 : f32 to vector<2x64xf32>
    %317 = arith.maximumf %315, %316 : vector<2x64xf32>
    %c0_59 = arith.constant 0 : index
    %c0_60 = arith.constant 0 : index
    %318 = vector.load %arg10[%c0_59, %c0_60] : memref<64x8xf32, #tpu.memory_space<vmem>>, vector<64x8xf32>
    %cst_61 = arith.constant dense<0.000000e+00> : vector<2x8xf32>
    %319 = tpu.matmul %317, %318, %cst_61 {dimension_numbers = #tpu.dot_dimension_numbers<[1], [0], [0], [1], [0, 0, 1, 1], [], []>} : vector<2x64xf32>, vector<64x8xf32>, vector<2x8xf32> -> vector<2x8xf32>
    %c0_62 = arith.constant 0 : index
    %c0_63 = arith.constant 0 : index
    %320 = vector.load %arg11[%c0_62, %c0_63] : memref<1x8xf32, #tpu.memory_space<vmem>>, vector<1x8xf32>
    %321 = vector.broadcast %320 : vector<1x8xf32> to vector<2x8xf32>
    %322 = arith.addf %319, %321 : vector<2x8xf32>
    %cst_64 = arith.constant 0.000000e+00 : f32
    %323 = vector.broadcast %cst_64 : f32 to vector<2x8xf32>
    %324 = arith.maximumf %322, %323 : vector<2x8xf32>
    %c0_65 = arith.constant 0 : index
    %c0_66 = arith.constant 0 : index
    %325 = vector.load %arg12[%c0_65, %c0_66] : memref<8x1xf32, #tpu.memory_space<vmem>>, vector<8x1xf32>
    %cst_67 = arith.constant dense<0.000000e+00> : vector<2x1xf32>
    %326 = tpu.matmul %324, %325, %cst_67 {dimension_numbers = #tpu.dot_dimension_numbers<[1], [0], [0], [1], [0, 0, 1, 1], [], []>} : vector<2x8xf32>, vector<8x1xf32>, vector<2x1xf32> -> vector<2x1xf32>
    %c0_68 = arith.constant 0 : index
    %c0_69 = arith.constant 0 : index
    %327 = vector.load %arg13[%c0_68, %c0_69] : memref<1x1xf32, #tpu.memory_space<vmem>>, vector<1x1xf32>
    %328 = vector.broadcast %327 : vector<1x1xf32> to vector<2x1xf32>
    %329 = arith.addf %326, %328 : vector<2x1xf32>
    %c0_70 = arith.constant 0 : index
    %c0_71 = arith.constant 0 : index
    %330 = vector.load %arg14[%c0_70, %c0_71] : memref<2x8xf32, #tpu.memory_space<vmem>>, vector<2x8xf32>
    tpu.vector_store %arg14[%c0_70, %c0_71], %324 {strides = array<i32>} : memref<2x8xf32, #tpu.memory_space<vmem>>, vector<2x8xf32>,
    %c0_72 = arith.constant 0 : index
    %c0_73 = arith.constant 0 : index
    %331 = vector.load %arg15[%c0_72, %c0_73] : memref<2x1xf32, #tpu.memory_space<vmem>>, vector<2x1xf32>
    tpu.vector_store %arg15[%c0_72, %c0_73], %329 {strides = array<i32>} : memref<2x1xf32, #tpu.memory_space<vmem>>, vector<2x1xf32>,
    return
  }
}

</mosaic_0001>

<bundles_post_ra>
// kernel: device_model_forward.1
= control target key start
LH: loop header
LB: loop body
LE: loop exit
PB: predicated region body
PF: predicated region fallthrough
CT: control target
= control target key end

     0   :  { %s3240_s0 = inlined_call_operand.vmem [shape: f32[16,4], index: 0, kind: input, shape index: {}]   ;;  %s3241_s1 = inlined_call_operand.vmem [shape: f32[4,64], index: 1, kind: input, shape index: {}]   ;;  %s3242_s2 = inlined_call_operand.vmem [shape: f32[16,64], index: 2, kind: input, shape index: {}]   ;;  %s3243_s3 = inlined_call_operand.vmem [shape: f32[1,64], index: 3, kind: input, shape index: {}]   ;;  %s3244_s4 = inlined_call_operand.vmem [shape: f32[32,64], index: 4, kind: input, shape index: {}]   ;;  %s3245_s5 = inlined_call_operand.vmem [shape: f32[1,64], index: 5, kind: input, shape index: {}]   ;;  %s3246_s6 = inlined_call_operand.vmem [shape: f32[16,64], index: 6, kind: input, shape index: {}]   ;;  %s3247_s7 = inlined_call_operand.vmem [shape: f32[1,64], index: 7, kind: input, shape index: {}]   ;;  %s3248_s8 = inlined_call_operand.vmem [shape: f32[64,64], index: 8, kind: input, shape index: {}]   ;;  %s3249_s9 = inlined_call_operand.vmem [shape: f32[1,64], index: 9, kind: input, shape index: {}]   ;;  %s3250_s10 = inlined_call_operand.vmem [shape: f32[64,8], index: 10, kind: input, shape index: {}]   ;;  %s3251_s11 = inlined_call_operand.vmem [shape: f32[1,8], index: 11, kind: input, shape index: {}]   ;;  %s3252_s12 = inlined_call_operand.vmem [shape: f32[8,1], index: 12, kind: input, shape index: {}]   ;;  %s3253_s13 = inlined_call_operand.<no memory space> [shape: f32[1,1], index: 13, kind: input, shape index: {}]   ;;  %s3254_s14 = inlined_call_operand.hbm [shape: f32[2,8], index: 14, kind: output, shape index: {0}]   ;;  %s3255_s15 = inlined_call_operand.vmem [shape: f32[2,1], index: 15, kind: output, shape index: {1}]  }
   0x1   :  { %v21_v0 = vstv %s3253_s13 }
   0x2   :  { %22 = vst [vmem:[#allocation2] sm:$0x1] %v21_v0 }
   0x3   :  { %v60_v1 = vld [vmem:[%s3241_s1] sm:$0xf]  ;;  %vm75_vm0 = vcmask 1043456   ;;  %vm68_vm1 = vcmask 31744   ;;  %v2708_v3 = vmov 0.0   ;;  %v2808_v4 = vld [vmem:[%s3242_s2 + $0x8] sm:$0xff] }
   0x4   :  { %v58_v2 = vld [vmem:[%s3240_s0] sm:$0xff]  ;;  %2352 = vmatprep.subr.msk.mxu0 %vm75_vm0, %v60_v1  ;;  %2357 = vmatprep.subr.mxu1 %v2708_v3  ;;  %v59_v5 = vld [vmem:[%s3240_s0 + $0x8] sm:$0xff] }
   0x5   :  { %2353 = vmatpush3.msk.msra.mxu0 %vm75_vm0, %v60_v1  ;;  %2354 = vmatprep.mubr.msk.f32.mxu0 %vm68_vm1, %v58_v2  ;;  %v2816_v6 = vld [vmem:[%s3242_s2] sm:$0xff] }
   0x6   :  { %23 = vsyncpa [#allocation4], 0  ;;  %2358 = vmatpush3.msra.mxu1 %v2808_v4  ;;  %2355 = vmatmul.mubr.msk.f32.vlgmr.msra.gmra.mxu0 %vm68_vm1, %v59_v5  ;;  %vm2709_vm2 = vmmov 0   ;;  %v2218_v7 = vld [vmem:[%s3243_s3] ss:$0 sm:$0xff]  ;;  %s2710_s28 = smov 96  }
   0x7   :  { %2359 = vmatprep.subr.mxu1 %v2708_v3  ;;  %2361 = vmatprep.mubr.msk.f32.mxu1 %vm2709_vm2, %v2708_v3  ;;  %s2711_s3 = smov 16   ;;  %v2850_v25 = vld [vmem:[%s3244_s4 + $0x18] sm:$0xff]  ;;  %v2855_v26 = vld [vmem:[%s3244_s4 + $0x10] sm:$0xff]  ;;  %v2862_v27 = vld [vmem:[%s3244_s4 + $0x8] sm:$0xff]  ;;  %s2712_s20 = smov 32   ;;  %vm161_vm3 = vcmask 130048  }
   0x8   :  { %2360 = vmatpush3.msra.mxu1 %v2816_v6  ;;  %2364 = vmatprep.subr.mxu0 %v2708_v3  ;;  %v2872_v29 = vld [vmem:[%s3244_s4] sm:$0xff]  ;;  %s2713_s23 = smov 80   ;;  %vm265_vm4 = vcmask 261120   ;;  %vm1950_vm5 = vcmask 523264   ;;  %vm2122_vm6 = vcmask 64512   ;;  %vm2196_vm7 = vcmask 58368  }
   0x9   :  { %2362 = vmatmul.mubr.f32.vlgmr.msra.gmra.mxu1 %v2708_v3  ;;  %2375 = vmatprep.subr.mxu1 %v2708_v3  ;;  %v2899_v34 = vld [vmem:[%s3245_s5] ss:$0 sm:$0xff] }
   0xa   :  { %2376 = vmatpush3.msra.mxu1 %v2808_v4  ;;  %2379 = vmatprep.mubr.msk.f32.mxu1 %vm2709_vm2, %v2708_v3 }
   0xb   :  { %2377 = vmatprep.subr.mxu1 %v2708_v3  ;;  %2372 = vmatprep.mubr.msk.f32.mxu0 %vm2709_vm2, %v2708_v3 }
   0xc   :  { %2378 = vmatpush3.msra.mxu1 %v2816_v6  ;;  %2365 = vmatpush3.msra.mxu0 %v2850_v25 }
   0xd   :  { %2382 = vmatprep.subr.mxu1 %v2708_v3  ;;  %2366 = vmatprep.subr.mxu0 %v2708_v3 }
   0xe   :  { %2367 = vmatpush3.msra.mxu0 %v2855_v26 }
   0xf   :  { %2368 = vmatprep.subr.mxu0 %v2708_v3 }
  0x10   :  { %2369 = vmatpush3.msra.mxu0 %v2862_v27 }
  0x11   :  { %2370 = vmatprep.subr.mxu0 %v2708_v3 }
  0x12   :  { %2371 = vmatpush3.msra.mxu0 %v2872_v29 }
  0x13   :  { %2393 = vmatprep.subr.mxu0 %v2708_v3 }
  0xc6   :  { %v2356_v8 = vpop.f32.mrf.mxu0 }
  0xc7   :  { %v2837_v9 = vadd.f32 %v2356_v8, %v2218_v7 }
  0xc8   :  { %v145_v10 = vpop.f32.mrf.mxu0 }
  0xc9   :  { %v2839_v11 = vadd.f32 %v2218_v7, %v145_v10  ;;  %v231_v12 = vpop.f32.mrf.mxu1 }
  0xcb   :  { %v235_v13 = vadd.f32 %v231_v12, %v2839_v11  ;;  %v2363_v14 = vpop.f32.mrf.mxu1 }
  0xcd   :  { %2558 = vtanh.f32 %v235_v13  ;;  %v2223_v16 = vmul.f32 -1.442695, %v235_v13 }
  0xcf   :  { %2560 = vpow2.f32 %v2223_v16 }
  0xda   :  { %v2559_v15 = vpop.eup %2558 }
  0xdb   :  { %245 = vrot.lane.b32.xlu0 %v2559_v15, %s2710_s28 }
  0xdc   :  { %v2561_v17 = vpop.eup %2560 }
  0xdd   :  { %v239_v18 = vadd.f32 1.0, %v2561_v17 }
  0xdf   :  { %2562 = vrcp.f32 %v239_v18 }
  0xec   :  { %v2563_v19 = vpop.eup %2562 }
  0xed   :  { %v243_v22 = vmul.f32 0.0, %v2563_v19 }
 0x14d   :  { %v246_v20 = vpop.permute.xlu0 %245 }
 0x14e   :  { %v248_v21 = vmul.f32 %v2563_v19, %v246_v20 }
 0x150   :  { %250 = vrot.lane.b32.xlu0 %v248_v21, %s2711_s3 }
 0x1c2   :  { %v251_v23 = vpop.permute.xlu0 %250 }
 0x1c3   :  { %v2844_v24 = vadd.f32 %v251_v23, %v243_v22 }
 0x1c5   :  { %2564 = vtanh.f32 %v2844_v24  ;;  %v447_v56 = vrot.slane %v2844_v24, 6 }
 0x1d2   :  { %v2565_v28 = vpop.eup %2564 }
 0x1d3   :  { %256 = vrot.lane.b32.xlu1 %v2565_v28, %s2712_s20 }
 0x245   :  { %v257_v30 = vpop.permute.xlu1 %256 }
 0x246   :  { %v259_v31 = vmul.f32 %v2563_v19, %v257_v30 }
 0x248   :  { %261 = vrot.lane.b32.xlu1 %v259_v31, %s2713_s23 }
 0x2ba   :  { %v262_v32 = vpop.permute.xlu1 %261 }
 0x2bb   :  { %v264_v33 = vsel %vm161_vm3, %v262_v32, 0.0  ;;  %2380 = vmatmul.mubr.msk.f32.vlgmr.msra.gmra.mxu1 %vm161_vm3, %v262_v32 }
 0x2bc   :  { %2373 = vmatmul.mubr.msk.f32.vlgmr.msra.gmra.mxu0 %vm265_vm4, %v264_v33  ;;  %2383 = vmatpush3.msra.mxu1 %v2850_v25 }
 0x2bd   :  { %2384 = vmatprep.subr.mxu1 %v2708_v3  ;;  %2394 = vmatpush3.msra.mxu0 %v2808_v4 }
 0x2be   :  { %2385 = vmatpush3.msra.mxu1 %v2855_v26  ;;  %2395 = vmatprep.subr.mxu0 %v2708_v3 }
 0x2bf   :  { %2386 = vmatprep.subr.mxu1 %v2708_v3  ;;  %2396 = vmatpush3.msra.mxu0 %v2816_v6 }
 0x2c0   :  { %2387 = vmatpush3.msra.mxu1 %v2862_v27  ;;  %2390 = vmatprep.mubr.msk.f32.mxu1 %vm2709_vm2, %v2708_v3 }
 0x2c1   :  { %2388 = vmatprep.subr.mxu1 %v2708_v3  ;;  %2397 = vmatprep.mubr.msk.f32.mxu0 %vm2709_vm2, %v2708_v3 }
 0x2c2   :  { %2389 = vmatpush3.msra.mxu1 %v2872_v29  ;;  %2400 = vmatprep.subr.mxu0 %v2708_v3 }
 0x2c3   :  { %2411 = vmatprep.subr.mxu1 %v2708_v3 }
 0x37b   :  { %v431_v35 = vpop.f32.mrf.mxu1 }
 0x37c   :  { %v436_v36 = vrot.slane %v431_v35, 6  ;;  %v335_v37 = vpop.f32.mrf.mxu0 }
 0x37d   :  { %v336_v38 = vadd.f32 %v2899_v34, %v335_v37  ;;  %v2381_v39 = vpop.f32.mrf.mxu1 }
 0x37e   :  { %v438_v40 = vadd.f32 %v436_v36, %v2839_v11  ;;  %v2374_v41 = vpop.f32.mrf.mxu0 }
 0x37f   :  { %2566 = vtanh.f32 %v336_v38  ;;  %v2225_v44 = vmul.f32 -1.442695, %v336_v38 }
 0x380   :  { %2568 = vtanh.f32 %v438_v40  ;;  %v2227_v45 = vmul.f32 -1.442695, %v438_v40 }
 0x381   :  { %2570 = vpow2.f32 %v2225_v44 }
 0x382   :  { %2572 = vpow2.f32 %v2227_v45 }
 0x38c   :  { %v2567_v42 = vpop.eup %2566 }
 0x38d   :  { %v2569_v43 = vpop.eup %2568  ;;  %348 = vrot.lane.b32.xlu0 %v2567_v42, %s2710_s28 }
 0x38e   :  { %451 = vrot.lane.b32.xlu1 %v2569_v43, %s2710_s28  ;;  %v2571_v46 = vpop.eup %2570 }
 0x38f   :  { %v2573_v47 = vpop.eup %2572  ;;  %v342_v48 = vadd.f32 1.0, %v2571_v46 }
 0x390   :  { %v442_v49 = vadd.f32 1.0, %v2573_v47 }
 0x391   :  { %2574 = vrcp.f32 %v342_v48 }
 0x392   :  { %2576 = vrcp.f32 %v442_v49 }
 0x39e   :  { %v2575_v50 = vpop.eup %2574 }
 0x39f   :  { %v2577_v52 = vpop.eup %2576  ;;  %v346_v57 = vmul.f32 0.0, %v2575_v50 }
 0x3a0   :  { %v449_v59 = vmul.f32 %v2577_v52, %v447_v56 }
 0x3ff   :  { %v349_v51 = vpop.permute.xlu0 %348 }
 0x400   :  { %v351_v53 = vmul.f32 %v2575_v50, %v349_v51  ;;  %v452_v54 = vpop.permute.xlu1 %451 }
 0x401   :  { %v454_v55 = vmul.f32 %v2577_v52, %v452_v54 }
 0x402   :  { %353 = vrot.lane.b32.xlu0 %v351_v53, %s2711_s3 }
 0x403   :  { %456 = vrot.lane.b32.xlu1 %v454_v55, %s2711_s3 }
 0x474   :  { %v354_v58 = vpop.permute.xlu0 %353 }
 0x475   :  { %v2908_v60 = vadd.f32 %v354_v58, %v346_v57  ;;  %v457_v61 = vpop.permute.xlu1 %456 }
 0x476   :  { %v2910_v62 = vadd.f32 %v457_v61, %v449_v59 }
 0x477   :  { %2578 = vtanh.f32 %v2908_v60 }
 0x478   :  { %2580 = vtanh.f32 %v2910_v62  ;;  %v661_v44 = vrot.slane %v2910_v62, 6 }
 0x484   :  { %v2579_v63 = vpop.eup %2578 }
 0x485   :  { %v2581_v0 = vpop.eup %2580  ;;  %359 = vrot.lane.b32.xlu0 %v2579_v63, %s2712_s20 }
 0x486   :  { %462 = vrot.lane.b32.xlu1 %v2581_v0, %s2712_s20 }
 0x4f7   :  { %v360_v1 = vpop.permute.xlu0 %359 }
 0x4f8   :  { %v362_v2 = vmul.f32 %v2575_v50, %v360_v1  ;;  %v463_v5 = vpop.permute.xlu1 %462 }
 0x4f9   :  { %v465_v7 = vmul.f32 %v2577_v52, %v463_v5 }
 0x4fa   :  { %v471_v8 = vrot.slane %v362_v2, 6 }
 0x4fb   :  { %467 = vrot.lane.b32.xlu0 %v465_v7, %s2713_s23  ;;  %v574_v10 = vrot.slane %v465_v7, 2 }
 0x4fc   :  { %472 = vrot.lane.b32.xlu1 %v471_v8, %s2710_s28 }
 0x4ff   :  { %575 = vrot.lane.b32.xlu0 %v574_v10, %s2713_s23 }
 0x56d   :  { %v468_v12 = vpop.permute.xlu0 %467 }
 0x56e   :  { %v473_v13 = vpop.permute.xlu1 %472 }
 0x56f   :  { %v475_v14 = vsel %vm161_vm3, %v468_v12, %v473_v13 }
 0x570   :  { %v477_v15 = vrot.slane %v475_v14, 2 }
 0x571   :  { %v576_v16 = vpop.permute.xlu0 %575 }
 0x572   :  { %2391 = vmatmul.mubr.msk.f32.vlgmr.msra.gmra.mxu1 %vm265_vm4, %v477_v15  ;;  %2398 = vmatmul.mubr.msk.f32.vlgmr.msra.gmra.mxu0 %vm161_vm3, %v576_v16 }
 0x573   :  { %2401 = vmatpush3.msra.mxu0 %v2850_v25  ;;  %2412 = vmatpush3.msra.mxu1 %v2808_v4 }
 0x574   :  { %2402 = vmatprep.subr.mxu0 %v2708_v3  ;;  %2413 = vmatprep.subr.mxu1 %v2708_v3 }
 0x575   :  { %2403 = vmatpush3.msra.mxu0 %v2855_v26  ;;  %2408 = vmatprep.mubr.msk.f32.mxu0 %vm2709_vm2, %v2708_v3 }
 0x576   :  { %2404 = vmatprep.subr.mxu0 %v2708_v3  ;;  %2414 = vmatpush3.msra.mxu1 %v2816_v6 }
 0x577   :  { %2405 = vmatpush3.msra.mxu0 %v2862_v27  ;;  %2415 = vmatprep.mubr.msk.f32.mxu1 %vm2709_vm2, %v2708_v3 }
 0x578   :  { %2406 = vmatprep.subr.mxu0 %v2708_v3  ;;  %2418 = vmatprep.subr.mxu1 %v2708_v3 }
 0x579   :  { %2407 = vmatpush3.msra.mxu0 %v2872_v29 }
 0x57a   :  { %2429 = vmatprep.subr.mxu0 %v2708_v3 }
 0x632   :  { %v546_v17 = vpop.f32.mrf.mxu1  ;;  %v645_v18 = vpop.f32.mrf.mxu0 }
 0x633   :  { %v547_v19 = vadd.f32 %v2899_v34, %v546_v17  ;;  %v650_v20 = vrot.slane %v645_v18, 4 }
 0x634   :  { %v2392_v21 = vpop.f32.mrf.mxu1  ;;  %v2399_v22 = vpop.f32.mrf.mxu0 }
 0x635   :  { %2582 = vtanh.f32 %v547_v19  ;;  %v652_v23 = vadd.f32 %v650_v20, %v2839_v11  ;;  %v2229_v30 = vmul.f32 -1.442695, %v547_v19 }
 0x637   :  { %2584 = vtanh.f32 %v652_v23  ;;  %v2231_v31 = vmul.f32 -1.442695, %v652_v23 }
 0x638   :  { %2586 = vpow2.f32 %v2229_v30 }
 0x639   :  { %2588 = vpow2.f32 %v2231_v31 }
 0x642   :  { %v2583_v24 = vpop.eup %2582 }
 0x643   :  { %559 = vrot.lane.b32.xlu1 %v2583_v24, %s2710_s28 }
 0x644   :  { %v2585_v28 = vpop.eup %2584 }
 0x645   :  { %665 = vrot.lane.b32.xlu0 %v2585_v28, %s2710_s28  ;;  %v2587_v32 = vpop.eup %2586 }
 0x646   :  { %v2589_v33 = vpop.eup %2588  ;;  %v553_v35 = vadd.f32 1.0, %v2587_v32 }
 0x647   :  { %v656_v36 = vadd.f32 1.0, %v2589_v33 }
 0x648   :  { %2590 = vrcp.f32 %v553_v35 }
 0x649   :  { %2592 = vrcp.f32 %v656_v36 }
 0x655   :  { %v2591_v37 = vpop.eup %2590 }
 0x656   :  { %v2593_v40 = vpop.eup %2592  ;;  %v557_v43 = vmul.f32 %v2591_v37, %v2908_v60 }
 0x657   :  { %v663_v47 = vmul.f32 %v2593_v40, %v661_v44 }
 0x6b5   :  { %v560_v38 = vpop.permute.xlu1 %559 }
 0x6b6   :  { %v562_v39 = vmul.f32 %v2591_v37, %v560_v38 }
 0x6b7   :  { %v666_v41 = vpop.permute.xlu0 %665 }
 0x6b8   :  { %564 = vrot.lane.b32.xlu1 %v562_v39, %s2711_s3  ;;  %v668_v42 = vmul.f32 %v2593_v40, %v666_v41 }
 0x6ba   :  { %670 = vrot.lane.b32.xlu0 %v668_v42, %s2711_s3 }
 0x72a   :  { %v565_v45 = vpop.permute.xlu1 %564 }
 0x72b   :  { %v2946_v46 = vadd.f32 %v565_v45, %v557_v43 }
 0x72c   :  { %v671_v48 = vpop.permute.xlu0 %670 }
 0x72d   :  { %2594 = vtanh.f32 %v2946_v46  ;;  %v2949_v49 = vadd.f32 %v671_v48, %v663_v47 }
 0x72f   :  { %2596 = vtanh.f32 %v2949_v49  ;;  %v875_v28 = vrot.slane %v2949_v49, 6 }
 0x73a   :  { %v2595_v50 = vpop.eup %2594 }
 0x73b   :  { %570 = vrot.lane.b32.xlu1 %v2595_v50, %s2712_s20 }
 0x73c   :  { %v2597_v51 = vpop.eup %2596 }
 0x73d   :  { %676 = vrot.lane.b32.xlu0 %v2597_v51, %s2712_s20 }
 0x7ad   :  { %v571_v52 = vpop.permute.xlu1 %570 }
 0x7ae   :  { %v573_v53 = vmul.f32 %v2591_v37, %v571_v52 }
 0x7af   :  { %v677_v55 = vpop.permute.xlu0 %676 }
 0x7b0   :  { %v685_v54 = vrot.slane %v573_v53, 4  ;;  %v679_v56 = vmul.f32 %v2593_v40, %v677_v55 }
 0x7b2   :  { %686 = vrot.lane.b32.xlu0 %v685_v54, %s2710_s28  ;;  %681 = vrot.lane.b32.xlu1 %v679_v56, %s2713_s23  ;;  %v788_v57 = vrot.slane %v679_v56, 4 }
 0x7b6   :  { %789 = vrot.lane.b32.xlu1 %v788_v57, %s2713_s23 }
 0x824   :  { %v687_v58 = vpop.permute.xlu0 %686  ;;  %v682_v59 = vpop.permute.xlu1 %681 }
 0x825   :  { %v689_v60 = vsel %vm161_vm3, %v682_v59, %v687_v58 }
 0x826   :  { %v691_v61 = vrot.slane %v689_v60, 4 }
 0x828   :  { %2409 = vmatmul.mubr.msk.f32.vlgmr.msra.gmra.mxu0 %vm265_vm4, %v691_v61  ;;  %v790_v62 = vpop.permute.xlu1 %789 }
 0x829   :  { %2416 = vmatmul.mubr.msk.f32.vlgmr.msra.gmra.mxu1 %vm161_vm3, %v790_v62  ;;  %2430 = vmatpush3.msra.mxu0 %v2808_v4 }
 0x82a   :  { %2419 = vmatpush3.msra.mxu1 %v2850_v25  ;;  %2431 = vmatprep.subr.mxu0 %v2708_v3 }
 0x82b   :  { %2420 = vmatprep.subr.mxu1 %v2708_v3  ;;  %2426 = vmatprep.mubr.msk.f32.mxu1 %vm2709_vm2, %v2708_v3 }
 0x82c   :  { %2421 = vmatpush3.msra.mxu1 %v2855_v26  ;;  %2432 = vmatpush3.msra.mxu0 %v2816_v6 }
 0x82d   :  { %2422 = vmatprep.subr.mxu1 %v2708_v3  ;;  %2433 = vmatprep.mubr.msk.f32.mxu0 %vm2709_vm2, %v2708_v3 }
 0x82e   :  { %2423 = vmatpush3.msra.mxu1 %v2862_v27  ;;  %2436 = vmatprep.subr.mxu0 %v2708_v3 }
 0x82f   :  { %2424 = vmatprep.subr.mxu1 %v2708_v3 }
 0x830   :  { %2425 = vmatpush3.msra.mxu1 %v2872_v29 }
 0x831   :  { %2447 = vmatprep.subr.mxu1 %v2708_v3 }
 0x8e8   :  { %v760_v63 = vpop.f32.mrf.mxu0 }
 0x8e9   :  { %v761_v0 = vadd.f32 %v2899_v34, %v760_v63  ;;  %v859_v1 = vpop.f32.mrf.mxu1 }
 0x8ea   :  { %v864_v2 = vrot.slane %v859_v1, 2  ;;  %v2410_v5 = vpop.f32.mrf.mxu0 }
 0x8eb   :  { %2598 = vtanh.f32 %v761_v0  ;;  %v2417_v7 = vpop.f32.mrf.mxu1  ;;  %v2233_v13 = vmul.f32 -1.442695, %v761_v0 }
 0x8ec   :  { %v866_v8 = vadd.f32 %v864_v2, %v2839_v11 }
 0x8ee   :  { %2600 = vtanh.f32 %v866_v8  ;;  %v2235_v14 = vmul.f32 -1.442695, %v866_v8 }
 0x8ef   :  { %2602 = vpow2.f32 %v2233_v13 }
 0x8f0   :  { %2604 = vpow2.f32 %v2235_v14 }
 0x8f8   :  { %v2599_v10 = vpop.eup %2598 }
 0x8f9   :  { %773 = vrot.lane.b32.xlu0 %v2599_v10, %s2710_s28 }
 0x8fb   :  { %v2601_v12 = vpop.eup %2600 }
 0x8fc   :  { %879 = vrot.lane.b32.xlu1 %v2601_v12, %s2710_s28  ;;  %v2603_v15 = vpop.eup %2602 }
 0x8fd   :  { %v2605_v16 = vpop.eup %2604  ;;  %v767_v17 = vadd.f32 1.0, %v2603_v15 }
 0x8fe   :  { %v870_v18 = vadd.f32 1.0, %v2605_v16 }
 0x8ff   :  { %2606 = vrcp.f32 %v767_v17 }
 0x900   :  { %2608 = vrcp.f32 %v870_v18 }
 0x90c   :  { %v2607_v19 = vpop.eup %2606 }
 0x90d   :  { %v2609_v21 = vpop.eup %2608  ;;  %v771_v24 = vmul.f32 %v2607_v19, %v2946_v46 }
 0x90e   :  { %v877_v32 = vmul.f32 %v2609_v21, %v875_v28 }
 0x96b   :  { %v774_v20 = vpop.permute.xlu0 %773 }
 0x96c   :  { %v776_v11 = vmul.f32 %v2607_v19, %v774_v20 }
 0x96e   :  { %778 = vrot.lane.b32.xlu0 %v776_v11, %s2711_s3  ;;  %v880_v22 = vpop.permute.xlu1 %879 }
 0x96f   :  { %v882_v23 = vmul.f32 %v2609_v21, %v880_v22 }
 0x971   :  { %884 = vrot.lane.b32.xlu1 %v882_v23, %s2711_s3 }
 0x9e0   :  { %v779_v30 = vpop.permute.xlu0 %778 }
 0x9e1   :  { %v2984_v31 = vadd.f32 %v779_v30, %v771_v24 }
 0x9e3   :  { %2610 = vtanh.f32 %v2984_v31  ;;  %v885_v33 = vpop.permute.xlu1 %884 }
 0x9e4   :  { %v2987_v35 = vadd.f32 %v885_v33, %v877_v32 }
 0x9e6   :  { %2612 = vtanh.f32 %v2987_v35  ;;  %v1086_v8 = vrot.slane %v2987_v35, 6 }
 0x9f0   :  { %v2611_v36 = vpop.eup %2610 }
 0x9f1   :  { %784 = vrot.lane.b32.xlu0 %v2611_v36, %s2712_s20 }
 0x9f3   :  { %v2613_v37 = vpop.eup %2612 }
 0x9f4   :  { %890 = vrot.lane.b32.xlu1 %v2613_v37, %s2712_s20 }
 0xa63   :  { %v785_v38 = vpop.permute.xlu0 %784 }
 0xa64   :  { %v787_v39 = vmul.f32 %v2607_v19, %v785_v38 }
 0xa66   :  { %v899_v40 = vrot.slane %v787_v39, 2  ;;  %v891_v41 = vpop.permute.xlu1 %890 }
 0xa67   :  { %v893_v42 = vmul.f32 %v2609_v21, %v891_v41 }
 0xa68   :  { %900 = vrot.lane.b32.xlu1 %v899_v40, %s2710_s28 }
 0xa69   :  { %895 = vrot.lane.b32.xlu0 %v893_v42, %s2713_s23  ;;  %v1002_v43 = vrot.slane %v893_v42, 6 }
 0xa6d   :  { %1003 = vrot.lane.b32.xlu0 %v1002_v43, %s2713_s23 }
 0xada   :  { %v901_v44 = vpop.permute.xlu1 %900 }
 0xadb   :  { %v896_v45 = vpop.permute.xlu0 %895 }
 0xadc   :  { %v903_v46 = vsel %vm161_vm3, %v896_v45, %v901_v44 }
 0xadd   :  { %v905_v47 = vrot.slane %v903_v46, 6 }
 0xadf   :  { %v1004_v48 = vpop.permute.xlu0 %1003  ;;  %2427 = vmatmul.mubr.msk.f32.vlgmr.msra.gmra.mxu1 %vm265_vm4, %v905_v47 }
 0xae0   :  { %2434 = vmatmul.mubr.msk.f32.vlgmr.msra.gmra.mxu0 %vm161_vm3, %v1004_v48  ;;  %2448 = vmatpush3.msra.mxu1 %v2808_v4 }
 0xae1   :  { %2437 = vmatpush3.msra.mxu0 %v2850_v25  ;;  %2449 = vmatprep.subr.mxu1 %v2708_v3 }
 0xae2   :  { %2438 = vmatprep.subr.mxu0 %v2708_v3  ;;  %2450 = vmatpush3.msra.mxu1 %v2816_v6 }
 0xae3   :  { %2439 = vmatpush3.msra.mxu0 %v2855_v26  ;;  %2451 = vmatprep.mubr.msk.f32.mxu1 %vm2709_vm2, %v2708_v3 }
 0xae4   :  { %2440 = vmatprep.subr.mxu0 %v2708_v3  ;;  %2444 = vmatprep.mubr.msk.f32.mxu0 %vm2709_vm2, %v2708_v3 }
 0xae5   :  { %2441 = vmatpush3.msra.mxu0 %v2862_v27  ;;  %2454 = vmatprep.subr.mxu1 %v2708_v3 }
 0xae6   :  { %2442 = vmatprep.subr.mxu0 %v2708_v3 }
 0xae7   :  { %2443 = vmatpush3.msra.mxu0 %v2872_v29 }
 0xae8   :  { %2465 = vmatprep.subr.mxu0 %v2708_v3 }
 0xb9f   :  { %v974_v49 = vpop.f32.mrf.mxu1 }
 0xba0   :  { %v975_v50 = vadd.f32 %v2899_v34, %v974_v49  ;;  %v1073_v51 = vpop.f32.mrf.mxu0 }
 0xba1   :  { %v1077_v52 = vadd.f32 %v1073_v51, %v2837_v9  ;;  %v2428_v53 = vpop.f32.mrf.mxu1 }
 0xba2   :  { %2614 = vtanh.f32 %v975_v50  ;;  %v2435_v54 = vpop.f32.mrf.mxu0  ;;  %v2237_v57 = vmul.f32 -1.442695, %v975_v50 }
 0xba3   :  { %2616 = vtanh.f32 %v1077_v52  ;;  %v2239_v58 = vmul.f32 -1.442695, %v1077_v52 }
 0xba4   :  { %2618 = vpow2.f32 %v2237_v57 }
 0xba5   :  { %2620 = vpow2.f32 %v2239_v58 }
 0xbaf   :  { %v2615_v55 = vpop.eup %2614 }
 0xbb0   :  { %v2617_v56 = vpop.eup %2616  ;;  %987 = vrot.lane.b32.xlu1 %v2615_v55, %s2710_s28 }
 0xbb1   :  { %1090 = vrot.lane.b32.xlu0 %v2617_v56, %s2710_s28  ;;  %v2619_v59 = vpop.eup %2618 }
 0xbb2   :  { %v2621_v60 = vpop.eup %2620  ;;  %v981_v61 = vadd.f32 1.0, %v2619_v59 }
 0xbb3   :  { %v1081_v62 = vadd.f32 1.0, %v2621_v60 }
 0xbb4   :  { %2622 = vrcp.f32 %v981_v61 }
 0xbb5   :  { %2624 = vrcp.f32 %v1081_v62 }
 0xbc1   :  { %v2623_v63 = vpop.eup %2622 }
 0xbc2   :  { %v2625_v1 = vpop.eup %2624  ;;  %v985_v10 = vmul.f32 %v2623_v63, %v2984_v31 }
 0xbc3   :  { %v1088_v13 = vmul.f32 %v2625_v1, %v1086_v8 }
 0xc22   :  { %v988_v0 = vpop.permute.xlu1 %987 }
 0xc23   :  { %v990_v2 = vmul.f32 %v2623_v63, %v988_v0  ;;  %v1091_v5 = vpop.permute.xlu0 %1090 }
 0xc24   :  { %v1093_v7 = vmul.f32 %v2625_v1, %v1091_v5 }
 0xc25   :  { %992 = vrot.lane.b32.xlu1 %v990_v2, %s2711_s3 }
 0xc26   :  { %1095 = vrot.lane.b32.xlu0 %v1093_v7, %s2711_s3 }
 0xc97   :  { %v993_v12 = vpop.permute.xlu1 %992 }
 0xc98   :  { %v3022_v14 = vadd.f32 %v993_v12, %v985_v10  ;;  %v1096_v15 = vpop.permute.xlu0 %1095 }
 0xc99   :  { %v3024_v16 = vadd.f32 %v1096_v15, %v1088_v13 }
 0xc9a   :  { %2626 = vtanh.f32 %v3022_v14 }
 0xc9b   :  { %2628 = vtanh.f32 %v3024_v16  ;;  %v1295_v51 = vrot.slane %v3024_v16, 6 }
 0xca7   :  { %v2627_v17 = vpop.eup %2626 }
 0xca8   :  { %v2629_v18 = vpop.eup %2628  ;;  %998 = vrot.lane.b32.xlu1 %v2627_v17, %s2712_s20 }
 0xca9   :  { %1101 = vrot.lane.b32.xlu0 %v2629_v18, %s2712_s20 }
 0xd1a   :  { %v999_v19 = vpop.permute.xlu1 %998 }
 0xd1b   :  { %v1001_v20 = vmul.f32 %v2623_v63, %v999_v19  ;;  %v1102_v11 = vpop.permute.xlu0 %1101 }
 0xd1c   :  { %v1104_v21 = vmul.f32 %v2625_v1, %v1102_v11 }
 0xd1d   :  { %1110 = vrot.lane.b32.xlu0 %v1001_v20, %s2710_s28 }
 0xd1e   :  { %1106 = vrot.lane.b32.xlu1 %v1104_v21, %s2713_s23 }
 0xd8f   :  { %v1111_v22 = vpop.permute.xlu0 %1110 }
 0xd90   :  { %v1107_v23 = vpop.permute.xlu1 %1106 }
 0xd91   :  { %v1113_v24 = vsel %vm161_vm3, %v1107_v23, %v1111_v22  ;;  %2452 = vmatmul.mubr.msk.f32.vlgmr.msra.gmra.mxu1 %vm161_vm3, %v1107_v23 }
 0xd92   :  { %2445 = vmatmul.mubr.msk.f32.vlgmr.msra.gmra.mxu0 %vm265_vm4, %v1113_v24  ;;  %2455 = vmatpush3.msra.mxu1 %v2850_v25 }
 0xd93   :  { %2456 = vmatprep.subr.mxu1 %v2708_v3  ;;  %2466 = vmatpush3.msra.mxu0 %v2808_v4 }
 0xd94   :  { %2457 = vmatpush3.msra.mxu1 %v2855_v26  ;;  %2467 = vmatprep.subr.mxu0 %v2708_v3 }
 0xd95   :  { %2458 = vmatprep.subr.mxu1 %v2708_v3  ;;  %2468 = vmatpush3.msra.mxu0 %v2816_v6 }
 0xd96   :  { %2459 = vmatpush3.msra.mxu1 %v2862_v27  ;;  %2462 = vmatprep.mubr.msk.f32.mxu1 %vm2709_vm2, %v2708_v3 }
 0xd97   :  { %2460 = vmatprep.subr.mxu1 %v2708_v3  ;;  %2469 = vmatprep.mubr.msk.f32.mxu0 %vm2709_vm2, %v2708_v3 }
 0xd98   :  { %2461 = vmatpush3.msra.mxu1 %v2872_v29  ;;  %2472 = vmatprep.subr.mxu0 %v2708_v3 }
 0xd99   :  { %2483 = vmatprep.subr.mxu1 %v2708_v3 }
 0xe51   :  { %v1279_v28 = vpop.f32.mrf.mxu1 }
 0xe52   :  { %v1284_v30 = vrot.slane %v1279_v28, 6  ;;  %v1183_v31 = vpop.f32.mrf.mxu0 }
 0xe53   :  { %v1184_v32 = vadd.f32 %v2899_v34, %v1183_v31  ;;  %v2453_v33 = vpop.f32.mrf.mxu1 }
 0xe54   :  { %v1286_v35 = vadd.f32 %v1284_v30, %v2837_v9  ;;  %v2446_v36 = vpop.f32.mrf.mxu0 }
 0xe55   :  { %2630 = vtanh.f32 %v1184_v32  ;;  %v2241_v39 = vmul.f32 -1.442695, %v1184_v32 }
 0xe56   :  { %2632 = vtanh.f32 %v1286_v35  ;;  %v2243_v40 = vmul.f32 -1.442695, %v1286_v35 }
 0xe57   :  { %2634 = vpow2.f32 %v2241_v39 }
 0xe58   :  { %2636 = vpow2.f32 %v2243_v40 }
 0xe62   :  { %v2631_v37 = vpop.eup %2630 }
 0xe63   :  { %v2633_v38 = vpop.eup %2632  ;;  %1196 = vrot.lane.b32.xlu1 %v2631_v37, %s2710_s28 }
 0xe64   :  { %1299 = vrot.lane.b32.xlu0 %v2633_v38, %s2710_s28  ;;  %v2635_v41 = vpop.eup %2634 }
 0xe65   :  { %v2637_v42 = vpop.eup %2636  ;;  %v1190_v43 = vadd.f32 1.0, %v2635_v41 }
 0xe66   :  { %v1290_v44 = vadd.f32 1.0, %v2637_v42 }
 0xe67   :  { %2638 = vrcp.f32 %v1190_v43 }
 0xe68   :  { %2640 = vrcp.f32 %v1290_v44 }
 0xe74   :  { %v2639_v45 = vpop.eup %2638 }
 0xe75   :  { %v2641_v47 = vpop.eup %2640  ;;  %v1194_v52 = vmul.f32 %v2639_v45, %v3022_v14 }
 0xe76   :  { %v1297_v54 = vmul.f32 %v2641_v47, %v1295_v51 }
 0xed5   :  { %v1197_v46 = vpop.permute.xlu1 %1196 }
 0xed6   :  { %v1199_v48 = vmul.f32 %v2639_v45, %v1197_v46  ;;  %v1300_v49 = vpop.permute.xlu0 %1299 }
 0xed7   :  { %v1302_v50 = vmul.f32 %v2641_v47, %v1300_v49 }
 0xed8   :  { %1201 = vrot.lane.b32.xlu1 %v1199_v48, %s2711_s3 }
 0xed9   :  { %1304 = vrot.lane.b32.xlu0 %v1302_v50, %s2711_s3 }
 0xf4a   :  { %v1202_v53 = vpop.permute.xlu1 %1201 }
 0xf4b   :  { %v3059_v55 = vadd.f32 %v1202_v53, %v1194_v52  ;;  %v1305_v56 = vpop.permute.xlu0 %1304 }
 0xf4c   :  { %v3061_v57 = vadd.f32 %v1305_v56, %v1297_v54 }
 0xf4d   :  { %2642 = vtanh.f32 %v3059_v55 }
 0xf4e   :  { %2644 = vtanh.f32 %v3061_v57  ;;  %v1509_v36 = vrot.slane %v3061_v57, 6 }
 0xf5a   :  { %v2643_v58 = vpop.eup %2642 }
 0xf5b   :  { %v2645_v59 = vpop.eup %2644  ;;  %1207 = vrot.lane.b32.xlu1 %v2643_v58, %s2712_s20 }
 0xf5c   :  { %1310 = vrot.lane.b32.xlu0 %v2645_v59, %s2712_s20 }
 0xfcd   :  { %v1208_v60 = vpop.permute.xlu1 %1207 }
 0xfce   :  { %v1210_v61 = vmul.f32 %v2639_v45, %v1208_v60  ;;  %v1311_v62 = vpop.permute.xlu0 %1310 }
 0xfcf   :  { %v1313_v63 = vmul.f32 %v2641_v47, %v1311_v62 }
 0xfd0   :  { %v1319_v0 = vrot.slane %v1210_v61, 6 }
 0xfd1   :  { %1315 = vrot.lane.b32.xlu1 %v1313_v63, %s2713_s23  ;;  %v1422_v1 = vrot.slane %v1313_v63, 2 }
 0xfd2   :  { %1320 = vrot.lane.b32.xlu0 %v1319_v0, %s2710_s28 }
 0xfd5   :  { %1423 = vrot.lane.b32.xlu1 %v1422_v1, %s2713_s23 }
0x1043   :  { %v1316_v2 = vpop.permute.xlu1 %1315 }
0x1044   :  { %v1321_v5 = vpop.permute.xlu0 %1320 }
0x1045   :  { %v1323_v7 = vsel %vm161_vm3, %v1316_v2, %v1321_v5 }
0x1046   :  { %v1325_v8 = vrot.slane %v1323_v7, 2 }
0x1047   :  { %v1424_v10 = vpop.permute.xlu1 %1423 }
0x1048   :  { %2463 = vmatmul.mubr.msk.f32.vlgmr.msra.gmra.mxu1 %vm265_vm4, %v1325_v8  ;;  %2470 = vmatmul.mubr.msk.f32.vlgmr.msra.gmra.mxu0 %vm161_vm3, %v1424_v10 }
0x1049   :  { %2473 = vmatpush3.msra.mxu0 %v2850_v25  ;;  %2484 = vmatpush3.msra.mxu1 %v2808_v4 }
0x104a   :  { %2474 = vmatprep.subr.mxu0 %v2708_v3  ;;  %2485 = vmatprep.subr.mxu1 %v2708_v3 }
0x104b   :  { %2475 = vmatpush3.msra.mxu0 %v2855_v26  ;;  %2480 = vmatprep.mubr.msk.f32.mxu0 %vm2709_vm2, %v2708_v3 }
0x104c   :  { %2476 = vmatprep.subr.mxu0 %v2708_v3  ;;  %2486 = vmatpush3.msra.mxu1 %v2816_v6 }
0x104d   :  { %2477 = vmatpush3.msra.mxu0 %v2862_v27  ;;  %2487 = vmatprep.mubr.msk.f32.mxu1 %vm2709_vm2, %v2708_v3 }
0x104e   :  { %2478 = vmatprep.subr.mxu0 %v2708_v3  ;;  %2490 = vmatprep.subr.mxu1 %v2708_v3 }
0x104f   :  { %2479 = vmatpush3.msra.mxu0 %v2872_v29 }
0x1050   :  { %2501 = vmatprep.subr.mxu0 %v2708_v3 }
0x1108   :  { %v1394_v4 = vpop.f32.mrf.mxu1  ;;  %v1493_v12 = vpop.f32.mrf.mxu0 }
0x1109   :  { %v1395_v13 = vadd.f32 %v2899_v34, %v1394_v4  ;;  %v1498_v14 = vrot.slane %v1493_v12, 4 }
0x110a   :  { %v2464_v15 = vpop.f32.mrf.mxu1  ;;  %v2471_v6 = vpop.f32.mrf.mxu0 }
0x110b   :  { %2646 = vtanh.f32 %v1395_v13  ;;  %v1500_v16 = vadd.f32 %v1498_v14, %v2837_v9  ;;  %v2245_v19 = vmul.f32 -1.442695, %v1395_v13 }
0x110d   :  { %2648 = vtanh.f32 %v1500_v16  ;;  %v2247_v20 = vmul.f32 -1.442695, %v1500_v16 }
0x110e   :  { %2650 = vpow2.f32 %v2245_v19 }
0x110f   :  { %2652 = vpow2.f32 %v2247_v20 }
0x1118   :  { %v2647_v17 = vpop.eup %2646 }
0x1119   :  { %1407 = vrot.lane.b32.xlu0 %v2647_v17, %s2710_s28 }
0x111a   :  { %v2649_v18 = vpop.eup %2648 }
0x111b   :  { %1513 = vrot.lane.b32.xlu1 %v2649_v18, %s2710_s28  ;;  %v2651_v11 = vpop.eup %2650 }
0x111c   :  { %v2653_v21 = vpop.eup %2652  ;;  %v1401_v22 = vadd.f32 1.0, %v2651_v11 }
0x111d   :  { %v1504_v23 = vadd.f32 1.0, %v2653_v21 }
0x111e   :  { %2654 = vrcp.f32 %v1401_v22 }
0x111f   :  { %2656 = vrcp.f32 %v1504_v23 }
0x112b   :  { %v2655_v24 = vpop.eup %2654 }
0x112c   :  { %v2657_v31 = vpop.eup %2656  ;;  %v1405_v35 = vmul.f32 %v2655_v24, %v3059_v55 }
0x112d   :  { %v1511_v39 = vmul.f32 %v2657_v31, %v1509_v36 }
0x118b   :  { %v1408_v28 = vpop.permute.xlu0 %1407 }
0x118c   :  { %v1410_v30 = vmul.f32 %v2655_v24, %v1408_v28 }
0x118d   :  { %v1514_v32 = vpop.permute.xlu1 %1513 }
0x118e   :  { %1412 = vrot.lane.b32.xlu0 %v1410_v30, %s2711_s3  ;;  %v1516_v33 = vmul.f32 %v2657_v31, %v1514_v32 }
0x1190   :  { %1518 = vrot.lane.b32.xlu1 %v1516_v33, %s2711_s3 }
0x1200   :  { %v1413_v37 = vpop.permute.xlu0 %1412 }
0x1201   :  { %v3097_v38 = vadd.f32 %v1413_v37, %v1405_v35 }
0x1202   :  { %v1519_v40 = vpop.permute.xlu1 %1518 }
0x1203   :  { %2658 = vtanh.f32 %v3097_v38  ;;  %v3100_v41 = vadd.f32 %v1519_v40, %v1511_v39 }
0x1205   :  { %2660 = vtanh.f32 %v3100_v41  ;;  %v1723_v12 = vrot.slane %v3100_v41, 6 }
0x1210   :  { %v2659_v42 = vpop.eup %2658 }
0x1211   :  { %1418 = vrot.lane.b32.xlu0 %v2659_v42, %s2712_s20 }
0x1212   :  { %v2661_v43 = vpop.eup %2660 }
0x1213   :  { %1524 = vrot.lane.b32.xlu1 %v2661_v43, %s2712_s20 }
0x1283   :  { %v1419_v44 = vpop.permute.xlu0 %1418 }
0x1284   :  { %v1421_v45 = vmul.f32 %v2655_v24, %v1419_v44 }
0x1285   :  { %v1525_v47 = vpop.permute.xlu1 %1524 }
0x1286   :  { %v1533_v46 = vrot.slane %v1421_v45, 4  ;;  %v1527_v48 = vmul.f32 %v2657_v31, %v1525_v47  ;;  %v1850_v45 = vld [vmem:[%s3246_s6] sm:$0xff] }
0x1288   :  { %1534 = vrot.lane.b32.xlu1 %v1533_v46, %s2710_s28  ;;  %1529 = vrot.lane.b32.xlu0 %v1527_v48, %s2713_s23  ;;  %v1636_v49 = vrot.slane %v1527_v48, 4 }
0x128c   :  { %1637 = vrot.lane.b32.xlu0 %v1636_v49, %s2713_s23  ;;  %v1942_v49 = vld [vmem:[%s3248_s8 + $0x38] sm:$0xff] }
0x12fa   :  { %v1535_v50 = vpop.permute.xlu1 %1534  ;;  %v1530_v51 = vpop.permute.xlu0 %1529 }
0x12fb   :  { %v1537_v52 = vsel %vm161_vm3, %v1530_v51, %v1535_v50  ;;  %v1941_v51 = vld [vmem:[%s3248_s8 + $0x30] sm:$0xff] }
0x12fc   :  { %v1539_v53 = vrot.slane %v1537_v52, 4  ;;  %v1940_v52 = vld [vmem:[%s3248_s8 + $0x28] sm:$0xff] }
0x12fe   :  { %2481 = vmatmul.mubr.msk.f32.vlgmr.msra.gmra.mxu0 %vm265_vm4, %v1539_v53  ;;  %v1638_v54 = vpop.permute.xlu0 %1637  ;;  %v1939_v53 = vld [vmem:[%s3248_s8 + $0x20] sm:$0xff] }
0x12ff   :  { %2488 = vmatmul.mubr.msk.f32.vlgmr.msra.gmra.mxu1 %vm161_vm3, %v1638_v54  ;;  %2505 = vmatprep.mubr.msk.f32.mxu0 %vm2709_vm2, %v2708_v3  ;;  %v1938_v54 = vld [vmem:[%s3248_s8 + $0x18] sm:$0xff] }
0x1300   :  { %2491 = vmatpush3.msra.mxu1 %v2850_v25  ;;  %2498 = vmatprep.mubr.msk.f32.mxu1 %vm2709_vm2, %v2708_v3 }
0x1301   :  { %2492 = vmatprep.subr.mxu1 %v2708_v3 }
0x1302   :  { %2493 = vmatpush3.msra.mxu1 %v2855_v26 }
0x1303   :  { %2494 = vmatprep.subr.mxu1 %v2708_v3 }
0x1304   :  { %2495 = vmatpush3.msra.mxu1 %v2862_v27 }
0x1305   :  { %2496 = vmatprep.subr.mxu1 %v2708_v3 }
0x1306   :  { %2497 = vmatpush3.msra.mxu1 %v2872_v29 }
0x1307   :  { %2527 = vmatprep.subr.mxu1 %v2708_v3 }
0x13be   :  { %v1608_v55 = vpop.f32.mrf.mxu0 }
0x13bf   :  { %v1609_v25 = vadd.f32 %v2899_v34, %v1608_v55  ;;  %v1707_v56 = vpop.f32.mrf.mxu1  ;;  %v1937_v55 = vld [vmem:[%s3248_s8 + $0x10] sm:$0xff] }
0x13c0   :  { %v1712_v57 = vrot.slane %v1707_v56, 2  ;;  %v2482_v58 = vpop.f32.mrf.mxu0  ;;  %v1935_v56 = vld [vmem:[%s3248_s8] sm:$0xff] }
0x13c1   :  { %2662 = vtanh.f32 %v1609_v25  ;;  %v2489_v59 = vpop.f32.mrf.mxu1  ;;  %v2249_v29 = vmul.f32 -1.442695, %v1609_v25  ;;  %v1936_v25 = vld [vmem:[%s3248_s8 + $0x8] sm:$0xff]  ;;  %v2031_v58 = vld [vmem:[%s3250_s10 + $0x30] sm:$0xff] }
0x13c2   :  { %v1714_v26 = vadd.f32 %v1712_v57, %v2837_v9  ;;  %v2032_v57 = vld [vmem:[%s3250_s10 + $0x38] sm:$0xff]  ;;  %v2030_v59 = vld [vmem:[%s3250_s10 + $0x28] sm:$0xff] }
0x13c4   :  { %2664 = vtanh.f32 %v1714_v26  ;;  %v2251_v61 = vmul.f32 -1.442695, %v1714_v26  ;;  %v2029_v26 = vld [vmem:[%s3250_s10 + $0x20] sm:$0xff] }
0x13c5   :  { %2666 = vpow2.f32 %v2249_v29 }
0x13c6   :  { %2668 = vpow2.f32 %v2251_v61 }
0x13ce   :  { %v2663_v60 = vpop.eup %2662 }
0x13cf   :  { %1621 = vrot.lane.b32.xlu1 %v2663_v60, %s2710_s28  ;;  %v2028_v60 = vld [vmem:[%s3250_s10 + $0x18] sm:$0xff] }
0x13d1   :  { %v2665_v27 = vpop.eup %2664 }
0x13d2   :  { %1727 = vrot.lane.b32.xlu0 %v2665_v27, %s2710_s28  ;;  %v2667_v62 = vpop.eup %2666  ;;  %v2254_v27 = vld [vmem:[%s3247_s7] ss:$0 sm:$0xff] }
0x13d3   :  { %v2669_v63 = vpop.eup %2668  ;;  %v1615_v0 = vadd.f32 1.0, %v2667_v62 }
0x13d4   :  { %v1718_v1 = vadd.f32 1.0, %v2669_v63 }
0x13d5   :  { %2670 = vrcp.f32 %v1615_v0  ;;  %v2027_v0 = vld [vmem:[%s3250_s10 + $0x10] sm:$0xff] }
0x13d6   :  { %2672 = vrcp.f32 %v1718_v1  ;;  %v2026_v1 = vld [vmem:[%s3250_s10 + $0x8] sm:$0xff] }
0x13e2   :  { %v2671_v2 = vpop.eup %2670 }
0x13e3   :  { %v2673_v7 = vpop.eup %2672  ;;  %v1619_v4 = vmul.f32 %v2671_v2, %v3097_v38 }
0x13e4   :  { %v1725_v15 = vmul.f32 %v2673_v7, %v1723_v12 }
0x1441   :  { %v1622_v5 = vpop.permute.xlu1 %1621 }
0x1442   :  { %v1624_v9 = vmul.f32 %v2671_v2, %v1622_v5  ;;  %v2256_v5 = vld [vmem:[%s3249_s9] ss:$0 sm:$0xff]  ;;  %s2714_s9 = smov [#allocation3]  }
0x1444   :  { %1626 = vrot.lane.b32.xlu1 %v1624_v9, %s2711_s3  ;;  %v1728_v8 = vpop.permute.xlu0 %1727 }
0x1445   :  { %v1730_v10 = vmul.f32 %v2673_v7, %v1728_v8 }
0x1447   :  { %1732 = vrot.lane.b32.xlu0 %v1730_v10, %s2711_s3 }
0x14b6   :  { %v1627_v13 = vpop.permute.xlu1 %1626 }
0x14b7   :  { %v1629_v14 = vadd.f32 %v1627_v13, %v1619_v4  ;;  %v2114_v4 = vld [vmem:[%s3252_s12] sm:$0xff] }
0x14b9   :  { %2674 = vtanh.f32 %v1629_v14  ;;  %v1733_v6 = vpop.permute.xlu0 %1732 }
0x14ba   :  { %v1735_v16 = vadd.f32 %v1733_v6, %v1725_v15 }
0x14bc   :  { %2676 = vtanh.f32 %v1735_v16 }
0x14c6   :  { %v2675_v17 = vpop.eup %2674 }
0x14c7   :  { %1632 = vrot.lane.b32.xlu1 %v2675_v17, %s2712_s20 }
0x14c9   :  { %v2677_v18 = vpop.eup %2676 }
0x14ca   :  { %1738 = vrot.lane.b32.xlu0 %v2677_v18, %s2712_s20 }
0x1539   :  { %v1633_v19 = vpop.permute.xlu1 %1632 }
0x153a   :  { %v1635_v20 = vmul.f32 %v2671_v2, %v1633_v19  ;;  %v2025_v2 = vld [vmem:[%s3250_s10] sm:$0xff]  ;;  %s2206_s10 = sshll.u32 %s2714_s9, 4  ;;  %s2207_s10 = int_to_ptr.vmem [resolvable:$true] %s2206_s10 }
0x153b   :  { %s2686_s22 = scalar_lea.vmem %s2207_s10, 32  ;;  %p2691_p1 = scmp.lt.s32.totalorder %s2207_s10, %s2207_s10 }
0x153c   :  { %v1747_v11 = vrot.slane %v1635_v20, 2  ;;  %v1739_v21 = vpop.permute.xlu0 %1738  ;;  %p2687_p0 = scmp.ne.s32.totalorder %s2207_s10, %s2686_s22  ;;  %p2692_p2 = scmp.lt.s32.totalorder %s2686_s22, %s2686_s22 }
0x153d   :  { %v1741_v22 = vmul.f32 %v2673_v7, %v1739_v21 }
0x153e   :  { %1748 = vrot.lane.b32.xlu0 %v1747_v11, %s2710_s28  ;;  %p2693_p3 = por %p2692_p2, %p2691_p1 }
0x153f   :  { %1743 = vrot.lane.b32.xlu1 %v1741_v22, %s2713_s23 }
0x1540   :  { %p2694_p4 = pnand %p2693_p3, %p2687_p0 }
0x15b0   :  { %v1749_v23 = vpop.permute.xlu0 %1748 }
0x15b1   :  { %v1744_v24 = vpop.permute.xlu1 %1743 }
0x15b2   :  { %v1751_v28 = vsel %vm161_vm3, %v1744_v24, %v1749_v23 }
0x15b3   :  { %v1753_v30 = vrot.slane %v1751_v28, 6 }
0x15b5   :  { %2499 = vmatmul.mubr.msk.f32.vlgmr.msra.gmra.mxu1 %vm265_vm4, %v1753_v30 }
0x15b6   :  { %2543 = vmatprep.mubr.msk.f32.mxu1 %vm2709_vm2, %v2708_v3  ;;  %2528 = vmatpush3.msra.mxu1 %v2032_v57 }
0x15b7   :  { %2529 = vmatprep.subr.mxu1 %v2708_v3 }
0x15b8   :  { %2530 = vmatpush3.msra.mxu1 %v2031_v58 }
0x15b9   :  { %2531 = vmatprep.subr.mxu1 %v2708_v3 }
0x15ba   :  { %2532 = vmatpush3.msra.mxu1 %v2030_v59 }
0x15bb   :  { %2533 = vmatprep.subr.mxu1 %v2708_v3 }
0x15bc   :  { %2534 = vmatpush3.msra.mxu1 %v2029_v26 }
0x15bd   :  { %2535 = vmatprep.subr.mxu1 %v2708_v3 }
0x15be   :  { %2536 = vmatpush3.msra.mxu1 %v2028_v60 }
0x15bf   :  { %2537 = vmatprep.subr.mxu1 %v2708_v3 }
0x15c0   :  { %2538 = vmatpush3.msra.mxu1 %v2027_v0 }
0x15c1   :  { %2539 = vmatprep.subr.mxu1 %v2708_v3 }
0x15c2   :  { %2540 = vmatpush3.msra.mxu1 %v2026_v1 }
0x15c3   :  { %2541 = vmatprep.subr.mxu1 %v2708_v3 }
0x15c4   :  { %2542 = vmatpush3.msra.mxu1 %v2025_v2 }
0x1675   :  { %v1822_v31 = vpop.f32.mrf.mxu1 }
0x1676   :  { %v1823_v32 = vadd.f32 %v2899_v34, %v1822_v31  ;;  %v1851_v34 = vld [vmem:[%s3246_s6 + $0x8] sm:$0xff] }
0x1677   :  { %v2500_v33 = vpop.f32.mrf.mxu1  ;;  %2502 = vmatpush3.msra.mxu0 %v1851_v34 }
0x1678   :  { %2678 = vtanh.f32 %v1823_v32  ;;  %v2253_v36 = vmul.f32 -1.442695, %v1823_v32  ;;  %2503 = vmatprep.subr.mxu0 %v2708_v3 }
0x1679   :  { %2504 = vmatpush3.msra.mxu0 %v1850_v45 }
0x167a   :  { %2680 = vpow2.f32 %v2253_v36  ;;  %2508 = vmatprep.subr.mxu0 %v2708_v3 }
0x1685   :  { %v2679_v35 = vpop.eup %2678 }
0x1686   :  { %1835 = vrot.lane.b32.xlu1 %v2679_v35, %s2710_s28 }
0x1687   :  { %v2681_v37 = vpop.eup %2680 }
0x1688   :  { %v1829_v38 = vadd.f32 1.0, %v2681_v37 }
0x168a   :  { %2682 = vrcp.f32 %v1829_v38 }
0x1697   :  { %v2683_v39 = vpop.eup %2682 }
0x1698   :  { %v1833_v42 = vmul.f32 %v2683_v39, %v1629_v14 }
0x16f8   :  { %v1836_v40 = vpop.permute.xlu1 %1835 }
0x16f9   :  { %v1838_v41 = vmul.f32 %v2683_v39, %v1836_v40 }
0x16fb   :  { %1840 = vrot.lane.b32.xlu0 %v1838_v41, %s2711_s3 }
0x176d   :  { %v1841_v43 = vpop.permute.xlu0 %1840 }
0x176e   :  { %v1843_v44 = vadd.f32 %v1841_v43, %v1833_v42 }
0x1770   :  { %2684 = vtanh.f32 %v1843_v44 }
0x177d   :  { %v2685_v46 = vpop.eup %2684 }
0x177e   :  { %1846 = vrot.lane.b32.xlu1 %v2685_v46, %s2712_s20 }
0x17f0   :  { %v1847_v47 = vpop.permute.xlu1 %1846 }
0x17f1   :  { %v1849_v48 = vmul.f32 %v2683_v39, %v1847_v47 }
0x17f3   :  { %1860 = vrot.lane.b32.xlu0 %v1849_v48, %s2713_s23 }
0x1865   :  { %v1861_v50 = vpop.permute.xlu0 %1860 }
0x1866   :  { %2506 = vmatmul.mubr.msk.f32.vlgmr.msra.gmra.mxu0 %vm161_vm3, %v1861_v50 }
0x1867   :  { %2509 = vmatpush3.msra.mxu0 %v1942_v49  ;;  %2524 = vmatprep.mubr.msk.f32.mxu0 %vm2709_vm2, %v2708_v3 }
0x1868   :  { %2510 = vmatprep.subr.mxu0 %v2708_v3 }
0x1869   :  { %2511 = vmatpush3.msra.mxu0 %v1941_v51 }
0x186a   :  { %2512 = vmatprep.subr.mxu0 %v2708_v3 }
0x186b   :  { %2513 = vmatpush3.msra.mxu0 %v1940_v52 }
0x186c   :  { %2514 = vmatprep.subr.mxu0 %v2708_v3 }
0x186d   :  { %2515 = vmatpush3.msra.mxu0 %v1939_v53 }
0x186e   :  { %2516 = vmatprep.subr.mxu0 %v2708_v3 }
0x186f   :  { %2517 = vmatpush3.msra.mxu0 %v1938_v54 }
0x1870   :  { %2518 = vmatprep.subr.mxu0 %v2708_v3 }
0x1871   :  { %2519 = vmatpush3.msra.mxu0 %v1937_v55 }
0x1872   :  { %2520 = vmatprep.subr.mxu0 %v2708_v3 }
0x1873   :  { %2521 = vmatpush3.msra.mxu0 %v1936_v25 }
0x1874   :  { %2522 = vmatprep.subr.mxu0 %v2708_v3 }
0x1875   :  { %2523 = vmatpush3.msra.mxu0 %v1935_v56 }
0x1876   :  { %2546 = vmatprep.subr.mxu0 %v2708_v3 }
0x1926   :  { %v1930_v29 = vpop.f32.mrf.mxu0 }
0x1927   :  { %v1931_v61 = vadd.f32 %v2254_v27, %v1930_v29 }
0x1928   :  { %v2507_v62 = vpop.f32.mrf.mxu0 }
0x1929   :  { %v1934_v63 = vmax.f32 %v1931_v61, 0.0 }
0x192b   :  { %2525 = vmatmul.mubr.msk.f32.vlgmr.msra.gmra.mxu0 %vm1950_vm5, %v1934_v63 }
0x192c   :  { %2548 = vmatprep.mubr.msk.f32.mxu0 %vm2709_vm2, %v2708_v3  ;;  %2547 = vmatpush3.msra.mxu0 %v2114_v4  ;;  %v2258_v3 = vld [vmem:[%s3251_s11] ss:$0 sm:$0xff] }
0x19eb   :  { %v2020_v9 = vpop.f32.mrf.mxu0 }
0x19ec   :  { %v2021_v7 = vadd.f32 %v2256_v5, %v2020_v9 }
0x19ed   :  { %v2526_v8 = vpop.f32.mrf.mxu0 }
0x19ee   :  { %v2024_v10 = vmax.f32 %v2021_v7, 0.0 }
0x19f0   :  { %2544 = vmatmul.mubr.msk.f32.vlgmr.msra.gmra.mxu1 %vm1950_vm5, %v2024_v10 }
0x1ab0   :  { %v2109_v12 = vpop.f32.mrf.mxu1 }
0x1ab1   :  { %v2110_v13 = vadd.f32 %v2258_v3, %v2109_v12 }
0x1ab2   :  { %v2545_v14 = vpop.f32.mrf.mxu1 }
0x1ab3   :  { %v2113_v15 = vmax.f32 %v2110_v13, 0.0 }
0x1ab5   :  { %2549 = vmatmul.mubr.msk.f32.vlgmr.msra.gmra.mxu0 %vm2122_vm6, %v2113_v15  ;;  %2197 = vst.msk [vmem:[#allocation3] sm:$0x3] %vm2196_vm7, %v2113_v15 }
0x1ab6   :  { %2697 = shalt.err (!%p2694_p4)
}
0x1ab7   :  { %2209 = dma.vmem_to_hbm [thread:$0]  %s2207_s10, 32, %s3254_s14, [#allocation4]   ;;  %v2260_v6 = vld [vmem:[#allocation2] ss:$0 sm:$0xff]  ;;  %vm2198_vm8 = vcmask 1024  }
0x1b75   :  { %v2192_v16 = vpop.f32.mrf.mxu0 }
0x1b76   :  { %v2193_v17 = vadd.f32 %v2260_v6, %v2192_v16 }
0x1b77   :  { %v2550_v18 = vpop.f32.mrf.mxu0 }
0x1b78   :  { %2199 = vst.msk [vmem:[%s3255_s15] sm:$0x3] %vm2198_vm8, %v2193_v17 }
0x1b79   :  { %2706 = dma.done.wait [#allocation4], 32  }
0x1b7a   :  { %2707 = vsyncadd [#allocation4], 4294967264 }
0x1b7b   :  { %2217 = vsyncpa [#allocation4], 1 }

</bundles_post_ra>
